<compile_context>
chip_gen: v7x
topology: tpu7x:2x2x1
jax: 0.10.0
libtpu: 0.0.40
codegen_flags: <defaults>
</compile_context>

<pallas_src>
import functools
import math

import jax
import jax.numpy as jnp
from jax.experimental import pallas as pl
from jax.experimental.pallas import tpu as pltpu


_LANE = 128      # lane-dense packed-output tile width (unmasked HBM writeback)
_IDX_BASE = 64   # lanes [0, topk) = weights, lanes [64, 64 + topk) = indices


def _round_up(x, m):
    return ((x + m - 1) // m) * m


def gate_kernel(x_ref, wt_ref, bias_ref, out_ref, *, topk, route_scale,
                n_experts):
    # x_ref:    (TB, D)    input dtype (f32 here); cast to bf16 in-kernel
    # wt_ref:   (D, E)     bf16, pre-transposed router weight (grid-invariant)
    # bias_ref: (1, E)     f32 dyn_bias
    # out_ref:  (TB, 128)  f32 packed output:
    #               lanes [0, topk)                -> routing weights
    #               lanes [_IDX_BASE, +topk)       -> expert indices (as f32)

    # Zero the packed output tile once (dense store; unused lanes stay 0).
    out_ref[...] = jnp.zeros_like(out_ref)

    # Router logits on the MXU: bf16 x bf16 -> f32 accumulation.  The f32->bf16
    # cast of x happens here on the VPU (hidden under the matmul / DMA) instead
    # of as a separate un-fused XLA op in the wrapper.
    x_bf16 = x_ref[...].astype(jnp.bfloat16)
    logits = jnp.dot(x_bf16, wt_ref[...],
                     preferred_element_type=jnp.float32)           # (TB, E)
    route_logits = logits + bias_ref[...]                          # (TB, E)

    # Softmax, hoisted out of the top-k loop: one full-width exp over (TB, E)
    # instead of topk lane-sparse exps on (TB, 1) columns.
    m = jnp.max(logits, axis=-1, keepdims=True)                    # (TB, 1)
    p = jnp.exp(logits - m)                                        # (TB, E)
    row_sum = jnp.sum(p, axis=-1, keepdims=True)                   # (TB, 1)
    inv_sum = pl.reciprocal(row_sum, approx=False)  # exact; (TB,1) is cheap
    probs_scaled = p * (inv_sum * jnp.float32(route_scale))        # (TB, E)

    tb = logits.shape[0]
    col_ids = jax.lax.broadcasted_iota(jnp.int32, (tb, n_experts), 1)
    neg_big = jnp.float32(-1e30)

    # Iterative top-k over the bias-adjusted route logits (k small & static).
    # Tie-break: lowest index, matching torch.topk / jax.lax.top_k.  Each
    # selected column is stored straight into the VMEM output block -- no
    # (TB, 128) vreg staging accumulators, no per-k full-width selects; the
    # HBM writeback remains one dense 128-lane DMA per tile.
    # TODO(synk): for E > 128 and topk >= 4 (XLU-bound regime), pack
    # (route_logit, ~index) into a single order-preserving int key and use one
    # max-reduce per k instead of three reductions.
    rl = route_logits
    for k in range(topk):
        max_val = jnp.max(rl, axis=-1, keepdims=True)
        is_max = rl == max_val
        idx = jnp.min(jnp.where(is_max, col_ids, n_experts),
                      axis=-1, keepdims=True)                      # (TB, 1) i32
        sel = col_ids == idx
        w = jnp.sum(jnp.where(sel, probs_scaled, jnp.float32(0.0)),
                    axis=-1, keepdims=True)                        # (TB, 1) f32
        out_ref[:, k:k + 1] = w
        out_ref[:, _IDX_BASE + k:_IDX_BASE + k + 1] = idx.astype(jnp.float32)
        rl = jnp.where(sel, neg_big, rl)


def prepare_gate_weight(weight):
    """Pre-transpose + cast the (E, D) router weight to a (D, E) bf16 operand.

    Done once (cached in a real model), not on every forward, so the HBM
    transpose is hoisted out of the hot path."""
    return weight.T.astype(jnp.bfloat16)


def _vmem_limit_bytes(est_bytes):
    """Per-generation VMEM cap with headroom (v7x has only 64 MiB physical)."""
    total = 64 * 1024 * 1024  # conservative default: v7x physical VMEM
    try:
        info = pltpu.get_tpu_info()
        for name in ("vmem_capacity_bytes", "vmem_size_bytes", "vmem_bytes"):
            val = getattr(info, name, None)
            if isinstance(val, int) and val > 0:
                total = val
                break
    except Exception:
        pass
    cap = (total * 3) // 4  # headroom for compiler scratch / semaphores / dbuf
    return int(min(cap, max(8 * 1024 * 1024, 4 * est_bytes)))


def gate_v2_forward(x, weight_t, dyn_bias, *, topk, route_scale, tb=256,
                    single_buffer_invariants=False, interpret=False):
    """x: (B, D) float, weight_t: (D, E) bf16 pre-transposed, dyn_bias: (E,).

    Returns (weights (B, topk) f32, indices (B, topk) i32)."""
    B, D = x.shape
    E = weight_t.shape[1]
    assert weight_t.shape[0] == D
    assert 0 < topk <= E and topk <= _IDX_BASE

    # Token-tile sizing: multiple of 8 sublanes, no wrapper-side pad (a partial
    # tail tile is handled by Pallas OOB masking).  Keep at least 2 grid steps
    # when possible so both v7x TensorCores get work on the parallel axis.
    tb = max(8, _round_up(min(tb, B), 8))
    if pl.cdiv(B, tb) < 2 and B > 8:
        tb = max(8, _round_up(pl.cdiv(B, 2), 8))
    grid = pl.cdiv(B, tb)

    bias2d = dyn_bias.reshape(1, E).astype(jnp.float32)

    kernel = functools.partial(gate_kernel, topk=topk,
                               route_scale=float(route_scale), n_experts=E)

    # Grid-invariant operands (weight, bias): optionally single-buffer them to
    # save VMEM for v7x production shapes (their index_map never changes, so
    # they are never re-fetched anyway).  Off by default.
    inv_mode = pl.Buffered(1) if single_buffer_invariants else None

    def _inv_spec(shape):
        if inv_mode is None:
            return pl.BlockSpec(shape, lambda b: (0, 0))
        return pl.BlockSpec(shape, lambda b: (0, 0), pipeline_mode=inv_mode)

    est = (2 * tb * D * x.dtype.itemsize     # double-buffered x tile
           + 2 * D * E * 2 + 2 * E * 4       # resident weight + bias (x2 bufs)
           + 2 * tb * _LANE * 4)             # packed output tile (x2 bufs)

    packed = pl.pallas_call(
        kernel,
        out_shape=jax.ShapeDtypeStruct((B, _LANE), jnp.float32),
        grid_spec=pltpu.PrefetchScalarGridSpec(
            num_scalar_prefetch=0,
            grid=(grid,),
            in_specs=[pl.BlockSpec((tb, D), lambda b: (b, 0)),
                      _inv_spec((D, E)),
                      _inv_spec((1, E))],
            out_specs=pl.BlockSpec((tb, _LANE), lambda b: (b, 0)),
        ),
        compiler_params=pltpu.CompilerParams(
            dimension_semantics=("parallel",),
            vmem_limit_bytes=_vmem_limit_bytes(est)),
        interpret=interpret,
    )(x, weight_t, bias2d)

    weights = packed[:, :topk]
    indices = packed[:, _IDX_BASE:_IDX_BASE + topk].astype(jnp.int32)
    return weights, indices


def gate_v2_reference(x, weight_t, dyn_bias, *, topk, route_scale):
    """Plain-JAX reference using the same bf16 matmul operands as the kernel."""
    logits = jnp.dot(x.astype(jnp.bfloat16), weight_t,
                     preferred_element_type=jnp.float32)
    route_logits = logits + dyn_bias.astype(jnp.float32)
    indices = jax.lax.top_k(route_logits, topk)[1]
    probs = jax.nn.softmax(logits, axis=-1)
    w = jnp.take_along_axis(probs, indices, axis=-1) * route_scale
    return w, indices


if __name__ == "__main__":
    # Small config consistent with the module's __init__:
    #   transformer_embed_dim=32, n_routed_experts=8, n_activated_experts=2
    B, D, E, TOPK = 256, 32, 8, 2
    ROUTE_SCALE = 2.0

    key = jax.random.PRNGKey(0)
    kx, kw = jax.random.split(key)

    x = jax.random.normal(kx, (B, D), dtype=jnp.float32)
    # kaiming_uniform_(a=sqrt(5)) on an (E, D) weight -> U(-1/sqrt(D), 1/sqrt(D))
    bound = 1.0 / math.sqrt(D)
    weight = jax.random.uniform(kw, (E, D), dtype=jnp.float32,
                                minval=-bound, maxval=bound)
    # dyn_bias buffer: zeros at init in PyTorch; nonzero here to exercise the
    # route_logits path.
    dyn_bias = jnp.linspace(-0.05, 0.05, E, dtype=jnp.float32)

    # Hoisted once (cached in a real model), not per forward.
    weight_t = prepare_gate_weight(weight)

    w_out, i_out = gate_v2_forward(x, weight_t, dyn_bias,
                                   topk=TOPK, route_scale=ROUTE_SCALE)
    jax.block_until_ready((w_out, i_out))

    # Sanity-check against a plain-JAX reference on the same bf16 operands.
    w_ref, i_ref = gate_v2_reference(x, weight_t, dyn_bias,
                                     topk=TOPK, route_scale=ROUTE_SCALE)
    assert w_out.shape == (B, TOPK) and i_out.shape == (B, TOPK)
    assert jnp.array_equal(i_out, i_ref.astype(jnp.int32)), "indices mismatch"
    assert jnp.allclose(w_out, w_ref, atol=1e-3, rtol=1e-2), "weights mismatch"

    print("KERNEL_OK")
</pallas_src>

<mosaic_0001>
module attributes {stable_mosaic.version = 11 : i64} {
  func.func @gate_kernel(%arg0: i32, %arg1: memref<128x32xf32, #tpu.memory_space<vmem>>, %arg2: memref<32x8xbf16, #tpu.memory_space<vmem>>, %arg3: memref<1x8xf32, #tpu.memory_space<vmem>>, %arg4: memref<128x128xf32, #tpu.memory_space<vmem>>) attributes {dimension_semantics = [#tpu.dimension_semantics<parallel>], iteration_bounds = array<i64: 2>, scalar_prefetch = 0 : i64, scratch_operands = 0 : i64, tpu.core_type = #tpu.core_type<tc>, window_params = [{transform_indices = @transform_0, window_bounds = array<i64: 128, 32>}, {pipeline_mode = #tpu.pipeline_mode<synchronous>, transform_indices = @transform_1, window_bounds = array<i64: 32, 8>}, {pipeline_mode = #tpu.pipeline_mode<synchronous>, transform_indices = @transform_2, window_bounds = array<i64: 1, 8>}, {transform_indices = @transform_3, window_bounds = array<i64: 128, 128>}]} {
    %cst = arith.constant 0.000000e+00 : f32
    %0 = vector.broadcast %cst : f32 to vector<128x128xf32>
    %c0 = arith.constant 0 : index
    %c0_0 = arith.constant 0 : index
    %1 = vector.load %arg4[%c0, %c0_0] : memref<128x128xf32, #tpu.memory_space<vmem>>, vector<128x128xf32>
    tpu.vector_store %arg4[%c0, %c0_0], %0 {strides = array<i32>} : memref<128x128xf32, #tpu.memory_space<vmem>>, vector<128x128xf32>,
    %c0_1 = arith.constant 0 : index
    %c0_2 = arith.constant 0 : index
    %2 = vector.load %arg1[%c0_1, %c0_2] : memref<128x32xf32, #tpu.memory_space<vmem>>, vector<128x32xf32>
    %3 = arith.truncf %2 : vector<128x32xf32> to vector<128x32xbf16>
    %c0_3 = arith.constant 0 : index
    %c0_4 = arith.constant 0 : index
    %4 = vector.load %arg2[%c0_3, %c0_4] : memref<32x8xbf16, #tpu.memory_space<vmem>>, vector<32x8xbf16>
    %cst_5 = arith.constant dense<0.000000e+00> : vector<128x8xf32>
    %5 = tpu.matmul %3, %4, %cst_5 {dimension_numbers = #tpu.dot_dimension_numbers<[1], [0], [0], [1], [0, 0, 1, 1], [], []>} : vector<128x32xbf16>, vector<32x8xbf16>, vector<128x8xf32> -> vector<128x8xf32>
    %c0_6 = arith.constant 0 : index
    %c0_7 = arith.constant 0 : index
    %6 = vector.load %arg3[%c0_6, %c0_7] : memref<1x8xf32, #tpu.memory_space<vmem>>, vector<1x8xf32>
    %7 = vector.broadcast %6 : vector<1x8xf32> to vector<128x8xf32>
    %8 = arith.addf %5, %7 : vector<128x8xf32>
    %cst_8 = arith.constant dense<0xFF800000> : vector<128xf32>
    %9 = vector.multi_reduction <maximumf>, %5, %cst_8 [1] : vector<128x8xf32> to vector<128xf32>
    %10 = vector.shape_cast %9 : vector<128xf32> to vector<128x1xf32>
    %11 = vector.broadcast %10 : vector<128x1xf32> to vector<128x8xf32>
    %12 = arith.subf %5, %11 : vector<128x8xf32>
    %13 = math.exp %12 : vector<128x8xf32>
    %cst_9 = arith.constant dense<0.000000e+00> : vector<128xf32>
    %14 = vector.multi_reduction <add>, %13, %cst_9 [1] : vector<128x8xf32> to vector<128xf32>
    %15 = vector.shape_cast %14 : vector<128xf32> to vector<128x1xf32>
    %16 = tpu.reciprocal %15 : vector<128x1xf32> -> vector<128x1xf32>
    %cst_10 = arith.constant 2.000000e+00 : f32
    %17 = vector.broadcast %cst_10 : f32 to vector<128x1xf32>
    %18 = arith.mulf %16, %17 : vector<128x1xf32>
    %19 = vector.broadcast %18 : vector<128x1xf32> to vector<128x8xf32>
    %20 = arith.mulf %13, %19 : vector<128x8xf32>
    %21 = tpu.iota {dimensions = array<i32: 1>} : vector<128x8xi32>
    %cst_11 = arith.constant dense<0xFF800000> : vector<128xf32>
    %22 = vector.multi_reduction <maximumf>, %8, %cst_11 [1] : vector<128x8xf32> to vector<128xf32>
    %23 = vector.shape_cast %22 : vector<128xf32> to vector<128x1xf32>
    %24 = vector.broadcast %23 : vector<128x1xf32> to vector<128x8xf32>
    %25 = arith.cmpf oeq, %8, %24 : vector<128x8xf32>
    %c8_i32 = arith.constant 8 : i32
    %26 = vector.broadcast %c8_i32 : i32 to vector<128x8xi32>
    %27 = arith.select %25, %21, %26 : vector<128x8xi1>, vector<128x8xi32>
    %cst_12 = arith.constant dense<2147483647> : vector<128xi32>
    %28 = vector.multi_reduction <minsi>, %27, %cst_12 [1] : vector<128x8xi32> to vector<128xi32>
    %29 = vector.shape_cast %28 : vector<128xi32> to vector<128x1xi32>
    %30 = vector.broadcast %29 : vector<128x1xi32> to vector<128x8xi32>
    %31 = arith.cmpi eq, %21, %30 : vector<128x8xi32>
    %cst_13 = arith.constant 0.000000e+00 : f32
    %32 = vector.broadcast %cst_13 : f32 to vector<128x8xf32>
    %33 = arith.select %31, %20, %32 : vector<128x8xi1>, vector<128x8xf32>
    %cst_14 = arith.constant dense<0.000000e+00> : vector<128xf32>
    %34 = vector.multi_reduction <add>, %33, %cst_14 [1] : vector<128x8xf32> to vector<128xf32>
    %35 = vector.shape_cast %34 : vector<128xf32> to vector<128x1xf32>
    %c0_15 = arith.constant 0 : index
    %c0_16 = arith.constant 0 : index
    %36 = vector.load %arg4[%c0_15, %c0_16] : memref<128x128xf32, #tpu.memory_space<vmem>>, vector<128x1xf32>
    tpu.vector_store %arg4[%c0_15, %c0_16], %35 {strides = array<i32>} : memref<128x128xf32, #tpu.memory_space<vmem>>, vector<128x1xf32>,
    %37 = arith.sitofp %29 : vector<128x1xi32> to vector<128x1xf32>
    %c0_17 = arith.constant 0 : index
    %c64 = arith.constant 64 : index
    %38 = vector.load %arg4[%c0_17, %c64] : memref<128x128xf32, #tpu.memory_space<vmem>>, vector<128x1xf32>
    tpu.vector_store %arg4[%c0_17, %c64], %37 {strides = array<i32>} : memref<128x128xf32, #tpu.memory_space<vmem>>, vector<128x1xf32>,
    %cst_18 = arith.constant -1.000000e+30 : f32
    %39 = vector.broadcast %cst_18 : f32 to vector<128x8xf32>
    %40 = arith.select %31, %39, %8 : vector<128x8xi1>, vector<128x8xf32>
    %cst_19 = arith.constant dense<0xFF800000> : vector<128xf32>
    %41 = vector.multi_reduction <maximumf>, %40, %cst_19 [1] : vector<128x8xf32> to vector<128xf32>
    %42 = vector.shape_cast %41 : vector<128xf32> to vector<128x1xf32>
    %43 = vector.broadcast %42 : vector<128x1xf32> to vector<128x8xf32>
    %44 = arith.cmpf oeq, %40, %43 : vector<128x8xf32>
    %c8_i32_20 = arith.constant 8 : i32
    %45 = vector.broadcast %c8_i32_20 : i32 to vector<128x8xi32>
    %46 = arith.select %44, %21, %45 : vector<128x8xi1>, vector<128x8xi32>
    %cst_21 = arith.constant dense<2147483647> : vector<128xi32>
    %47 = vector.multi_reduction <minsi>, %46, %cst_21 [1] : vector<128x8xi32> to vector<128xi32>
    %48 = vector.shape_cast %47 : vector<128xi32> to vector<128x1xi32>
    %49 = vector.broadcast %48 : vector<128x1xi32> to vector<128x8xi32>
    %50 = arith.cmpi eq, %21, %49 : vector<128x8xi32>
    %cst_22 = arith.constant 0.000000e+00 : f32
    %51 = vector.broadcast %cst_22 : f32 to vector<128x8xf32>
    %52 = arith.select %50, %20, %51 : vector<128x8xi1>, vector<128x8xf32>
    %cst_23 = arith.constant dense<0.000000e+00> : vector<128xf32>
    %53 = vector.multi_reduction <add>, %52, %cst_23 [1] : vector<128x8xf32> to vector<128xf32>
    %54 = vector.shape_cast %53 : vector<128xf32> to vector<128x1xf32>
    %c0_24 = arith.constant 0 : index
    %c1 = arith.constant 1 : index
    %55 = vector.load %arg4[%c0_24, %c1] : memref<128x128xf32, #tpu.memory_space<vmem>>, vector<128x1xf32>
    tpu.vector_store %arg4[%c0_24, %c1], %54 {strides = array<i32>} : memref<128x128xf32, #tpu.memory_space<vmem>>, vector<128x1xf32>,
    %56 = arith.sitofp %48 : vector<128x1xi32> to vector<128x1xf32>
    %c0_25 = arith.constant 0 : index
    %c65 = arith.constant 65 : index
    %57 = vector.load %arg4[%c0_25, %c65] : memref<128x128xf32, #tpu.memory_space<vmem>>, vector<128x1xf32>
    tpu.vector_store %arg4[%c0_25, %c65], %56 {strides = array<i32>} : memref<128x128xf32, #tpu.memory_space<vmem>>, vector<128x1xf32>,
    return
  }
  func.func @transform_0(%arg0: i32) -> (i32, i32) {
    %c0_i32 = arith.constant 0 : i32
    %c0_i32_0 = arith.constant 0 : i32
    return %arg0, %c0_i32 : i32, i32
  }
  func.func @transform_1(%arg0: i32) -> (i32, i32) {
    %c0_i32 = arith.constant 0 : i32
    %c0_i32_0 = arith.constant 0 : i32
    %c0_i32_1 = arith.constant 0 : i32
    return %c0_i32, %c0_i32_0 : i32, i32
  }
  func.func @transform_2(%arg0: i32) -> (i32, i32) {
    %c0_i32 = arith.constant 0 : i32
    %c0_i32_0 = arith.constant 0 : i32
    %c0_i32_1 = arith.constant 0 : i32
    return %c0_i32, %c0_i32_0 : i32, i32
  }
  func.func @transform_3(%arg0: i32) -> (i32, i32) {
    %c0_i32 = arith.constant 0 : i32
    %c0_i32_0 = arith.constant 0 : i32
    return %arg0, %c0_i32 : i32, i32
  }
}

</mosaic_0001>

<bundles_post_ra>
// kernel: tpu_custom_call.1
= control target key start
LH: loop header
LB: loop body
LE: loop exit
PB: predicated region body
PF: predicated region fallthrough
CT: control target
= control target key end

     0   :  { %8 = vsyncpa [#allocation3], 0  ;;  %s3239_s0 = inlined_call_operand.vmem [shape: f32[256,32], index: 0, kind: input, shape index: {}]   ;;  %s3240_s1 = inlined_call_operand.vmem [shape: bf16[32,8], index: 1, kind: input, shape index: {}]   ;;  %s3241_s2 = inlined_call_operand.vmem [shape: f32[1,8], index: 2, kind: input, shape index: {}]   ;;  %s3242_s3 = inlined_call_operand.hbm [shape: f32[256,128], index: 3, kind: output, shape index: {}]  }
   0x1   :  { %10 = vsyncpa [#allocation3 + $0x1], 0  ;;  %s1815_s12 = smov 0   ;;  %s1817_s13 = smov 0  }
   0x2   :  { %s1819_s14 = smov 0   ;;  %s1821_s15 = smov 0  }
   0x3 LB: > { %s1836_s16 = sadd.s32 4294967295, %s1789_s15   ;;  %s1561_s17 = sadd.s32 4294967294, %s1789_s15   ;;  %s1789_s15 = sphi %s1821_s15, %s3365_s15   ;;  %s1785_s14 = sphi %s1819_s14, %s3364_s14   ;;  %s1781_s13 = sphi %s1817_s13, %s3363_s13   ;;  %s1777_s12 = sphi %s1815_s12, %s3362_s12  }
   0x4   : > { %s1840_s18 = sadd.s32 1, %s1789_s15   ;;  %s91_s19 = sadd.s32 1, %s1785_s14 }
   0x5   : > { %s88_s20 = ssub.s32 %s1789_s15, %s1840_s18  ;;  %p101_p0 = scmp.ne.s32.totalorder %s1785_s14, %s1781_s13 }
   0x6   : > { %p89_p1 = scmp.eq.s32.totalorder %s88_s20, 0  ;;  %p102_p2 = scmp.eq.s32.totalorder %s1836_s16, 1 }
   0x7   : > { %p107_p3 = scmp.ne.s32.totalorder %s1781_s13, %s1777_s12  ;;  %p108_p4 = scmp.eq.s32.totalorder %s1561_s17, 1 }
   0x8   : > { %s1851_s21 = scalar_select %p89_p1, %s1785_s14, %s91_s19  }
   0x9   : > { %p1853_p5 = por %p102_p2, %p101_p0  ;;  %p1857_p6 = por %p108_p4, %p107_p3 }
   0xa   : > { %p1564_p7 = scmp.ge.s32.totalorder %s1789_s15, 1  ;;  %p141_p8 = scmp.lt.s32.totalorder %s1789_s15, 3 }
   0xc   : > { %p142_p9 = pnand %p1564_p7, %p141_p8 }
   0xe   : > { %145 = sbr.rel (%p142_p9) target bundleno = 1321 (0x529), region = 32 }
  0x15   : > { %v1661_v0 = vld [vmem:[%s3240_s1] sm:$0xff]   ;;  %s1566_s26 = sshll.u32 %s1836_s16, 4  ;;  %v1662_v1 = vld [vmem:[%s3240_s1 + $0x8] sm:$0xff]   ;;  %vm229_vm0 = vcmask 261120   ;;  %vm374_vm1 = vcmask 64512   ;;  %s162_s8 = sand.u32 1, %s1781_s13  }
  0x16   : > { %p166_p10 = scmp.lt.s32.totalorder %s1566_s26, 31  ;;  %1595 = vmatprep.subr.bf16.mxu0 %v1661_v0  ;;  %1615 = vmatprep.subr.bf16.mxu1 %v1661_v0  ;;  %v1578_v26 = vld [vmem:[%s3241_s2] ss:$0 sm:$0xff]  ;;  %s1565_s9 = sshll.u32 %s162_s8, 7 }
  0x17   : > { %1596 = vmatpush3.bf16.msra.mxu0 %v1661_v0  ;;  %1617 = vmatpush3.bf16.msra.mxu1 %v1661_v0  ;;  %s2840_s10 = scalar_lea.vmem [#allocation2], %s1565_s9  ;;  %s1584_s11 = sshll.u32 %s1836_s16, 11 }
  0x18   : > { %s3367_s26 = smov (!%p166_p10, %s1566_s26), 31  ;;  %1597 = vmatprep.subr.bf16.mxu0 %v1662_v1  ;;  %1616 = vmatprep.subr.bf16.mxu1 %v1662_v1  ;;  %s1499_s17 = sshll.u32 %s2840_s10, 4  ;;  %s3189_s17 = int_to_ptr.vmem [resolvable:$true] %s1499_s17 }
  0x19   : > { %s1567_s29 = sshll.u32 %s3367_s26, 3  ;;  %s3187_s24 = scalar_lea.hbm %s3242_s3, %s1584_s11 }
  0x1a   : > { %s169_s5 = scalar_lea.vmem %s3239_s0, %s1567_s29  ;;  %s3198_s16 = scalar_lea.sflag [#allocation3], %s162_s8 }
  0x1b   : > { %1598 = vmatpush3.bf16.msra.mxu0 %v1662_v1  ;;  %1618 = vmatpush3.bf16.msra.mxu1 %v1662_v1  ;;  %v189_v2 = vld [vmem:[%s169_s5] sm:$0xff]  ;;  %v190_v3 = vld [vmem:[%s169_s5 + $0x8] sm:$0xff]  ;;  %v191_v7 = vld [vmem:[%s169_s5 + $0x10] sm:$0xff]  ;;  %s1727_s25 = scalar_lea.vmem %s3189_s17, 2048  ;;  %s1792_s26 = smov [#allocation2]  }
  0x1c   : > { %v197_v4 = vld [vmem:[%s169_s5 + $0x40] sm:$0xff]  ;;  %v205_v5 = vpack.c.bf16 %v190_v3, %v189_v2  ;;  %v198_v6 = vld [vmem:[%s169_s5 + $0x48] sm:$0xff]  ;;  %v192_v8 = vld [vmem:[%s169_s5 + $0x18] sm:$0xff]  ;;  %p1728_p11 = scmp.ne.s32.totalorder %s3189_s17, %s1727_s25  ;;  %s1731_s27 = sshll.u32 %s1792_s26, 4  ;;  %s1732_s27 = int_to_ptr.vmem [resolvable:$false] %s1731_s27 }
  0x1d   : > { %v209_v9 = vpack.c.bf16 %v198_v6, %v197_v4  ;;  %v206_v10 = vpack.c.bf16 %v192_v8, %v191_v7  ;;  %v199_v11 = vld [vmem:[%s169_s5 + $0x50] sm:$0xff]  ;;  %v200_v12 = vld [vmem:[%s169_s5 + $0x58] sm:$0xff]  ;;  %v193_v13 = vld [vmem:[%s169_s5 + $0x20] sm:$0xff]  ;;  %s1733_s28 = scalar_lea.vmem %s1732_s27, 4096  ;;  %p1734_p0 = scmp.lt.s32.totalorder %s3189_s17, %s1732_s27 }
  0x1e   : > { %1599 = vmatprep.mubr.msk.bf16.mxu0 %vm229_vm0, %v205_v5  ;;  %v210_v14 = vpack.c.bf16 %v200_v12, %v199_v11  ;;  %v194_v15 = vld [vmem:[%s169_s5 + $0x28] sm:$0xff]  ;;  %v201_v17 = vld [vmem:[%s169_s5 + $0x60] sm:$0xff]  ;;  %v195_v19 = vld [vmem:[%s169_s5 + $0x30] sm:$0xff]  ;;  %v567_v11 = vlaneseq  ;;  %p1729_p12 = pnand %p1728_p11, %p1853_p5  ;;  %p1735_p1 = scmp.lt.s32.totalorder %s1733_s28, %s1727_s25 }
  0x1f   : > { %1607 = vmatprep.mubr.msk.bf16.mxu1 %vm229_vm0, %v209_v9  ;;  %1600 = vmatmul.mubr.msk.bf16.vlgmr.msra.gmra.mrb[0].mxu0 %vm229_vm0, %v206_v10  ;;  %v207_v16 = vpack.c.bf16 %v194_v15, %v193_v13  ;;  %v202_v18 = vld [vmem:[%s169_s5 + $0x68] sm:$0xff]  ;;  %v196_v20 = vld [vmem:[%s169_s5 + $0x38] sm:$0xff]  ;;  %v203_v22 = vld [vmem:[%s169_s5 + $0x70] sm:$0xff] }
  0x20   : > { %1608 = vmatmul.mubr.msk.bf16.vlgmr.msra.gmra.mrb[0].mxu1 %vm229_vm0, %v210_v14  ;;  %v211_v21 = vpack.c.bf16 %v202_v18, %v201_v17  ;;  %v204_v23 = vld [vmem:[%s169_s5 + $0x78] sm:$0xff]  ;;  %v208_v24 = vpack.c.bf16 %v196_v20, %v195_v19  ;;  %v1996_v12 = vand.u32 127, %v567_v11  ;;  %p1730_p13 = pneg %p1729_p12  ;;  %p1736_p2 = por %p1735_p1, %p1734_p0 }
  0x21   : > { %1603 = vmatprep.mubr.msk.bf16.mxu0 %vm229_vm0, %v207_v16  ;;  %v212_v25 = vpack.c.bf16 %v204_v23, %v203_v22 }
  0x22   : > { %1611 = vmatprep.mubr.msk.bf16.mxu1 %vm229_vm0, %v211_v21  ;;  %p1737_p3 = pnand %p1736_p2, %p1730_p13 }
  0x27   : > { %1604 = vmatmul.mubr.msk.bf16.gmra.mrb[4].mxu0 %vm229_vm0, %v208_v24 }
  0x28   : > { %1612 = vmatmul.mubr.msk.bf16.gmra.mrb[4].mxu1 %vm229_vm0, %v212_v25 }
  0xf2   : > { %v1884_v27 = vpop.f32.mrb[0].mxu0 }
  0xf3   : > { %v1887_v28 = vadd.f32 %v1884_v27, %v1578_v26  ;;  %v1889_v29 = vpop.f32.mrb[0].mxu1  ;;  %v1891_v30 = vpop.f32.mrb[1].mxu0 }
  0xf4   : > { %3303 = vst [vmem:[#allocation5_spill] sm:$0xff] %v1889_v29  ;;  %v1894_v31 = vadd.f32 %v1889_v29, %v1578_v26  ;;  %v1896_v32 = vpop.f32.mrb[1].mxu1  ;;  %v1898_v33 = vpop.f32.mrb[2].mxu0  ;;  %v1910_v38 = vadd.f32 %v1578_v26, %v1891_v30 }
  0xf5   : > { %3304 = vst [vmem:[#allocation6_spill] sm:$0xff] %v1896_v32  ;;  %3305 = vst [vmem:[#allocation7_spill] sm:$0xff] %v1898_v33  ;;  %v1901_v34 = vadd.f32 %v1898_v33, %v1578_v26  ;;  %v1903_v35 = vpop.f32.mrb[2].mxu1  ;;  %v1905_v36 = vpop.f32.mrb[3].mxu0  ;;  %v575_v37 = vsel %vm374_vm1, %v1887_v28, -inf  ;;  %v1922_v43 = vadd.f32 %v1578_v26, %v1896_v32 }
  0xf6   : > { %3306 = vst [vmem:[#allocation8_spill] sm:$0xff] %v1903_v35  ;;  %v1912_v39 = vpop.f32.mrb[3].mxu1  ;;  %v599_v40 = vsel %vm374_vm1, %v1894_v31, -inf  ;;  %576 = vmax.xlane.f32.xlu1 %v575_v37  ;;  %v1917_v41 = vadd.f32 %v1903_v35, %v1578_v26  ;;  %v569_v44 = vsel %vm374_vm1, %v1910_v38, -inf  ;;  %v1946_v54 = vadd.f32 %v1578_v26, %v1905_v36 }
  0xf7   : > { %3307 = vst [vmem:[#allocation9_spill] sm:$0xff] %v1912_v39  ;;  %600 = vmax.xlane.f32.xlu0 %v599_v40  ;;  %v578_v42 = vsel %vm374_vm1, %v1901_v34, -inf  ;;  %v1937_v50 = vadd.f32 %v1578_v26, %v1912_v39  ;;  %v593_v55 = vsel %vm374_vm1, %v1922_v43, -inf }
  0xf8   : > { %v602_v51 = vsel %vm374_vm1, %v1917_v41, -inf  ;;  %v572_v60 = vsel %vm374_vm1, %v1946_v54, -inf }
  0xf9   : > { %v596_v59 = vsel %vm374_vm1, %v1937_v50, -inf }
  0xfa   : > { %579 = vmax.xlane.f32.xlu1 %v578_v42  ;;  %v1926_v45 = vpop.f32.mrb[4].mxu0 }
  0xfb   : > { %3308 = vst [vmem:[#allocation10_spill] sm:$0xff] %v1926_v45  ;;  %570 = vmax.xlane.f32.xlu0 %v569_v44  ;;  %v1928_v46 = vpop.f32.mrb[5].mxu0  ;;  %v1930_v47 = vpop.f32.mrb[4].mxu1  ;;  %v1956_v58 = vadd.f32 %v1926_v45, %v1578_v26 }
  0xfc   : > { %3309 = vst [vmem:[#allocation11_spill] sm:$0xff] %v1930_v47  ;;  %v1932_v48 = vpop.f32.mrb[6].mxu0  ;;  %v1934_v49 = vpop.f32.mrb[5].mxu1  ;;  %v1970_v0 = vadd.f32 %v1578_v26, %v1928_v46  ;;  %v1990_v8 = vadd.f32 %v1930_v47, %v1578_v26 }
  0xfd   : > { %3310 = vst [vmem:[#allocation12_spill] sm:$0xff] %v1932_v48  ;;  %3311 = vst [vmem:[#allocation13_spill] sm:$0xff] %v1934_v49  ;;  %v1941_v52 = vpop.f32.mrb[7].mxu0  ;;  %v1943_v53 = vpop.f32.mrb[6].mxu1  ;;  %v1953_v57 = vadd.f32 %v1932_v48, %v1578_v26  ;;  %v587_v62 = vsel %vm374_vm1, %v1956_v58, -inf  ;;  %v1976_v2 = vadd.f32 %v1578_v26, %v1934_v49 }
  0xfe   : > { %3312 = vst [vmem:[#allocation14_spill] sm:$0xff] %v1941_v52  ;;  %3313 = vst [vmem:[#allocation15_spill] sm:$0xff] %v1943_v53  ;;  %603 = vmax.xlane.f32.xlu1 %v602_v51  ;;  %v1950_v56 = vpop.f32.mrb[7].mxu1  ;;  %v1967_v63 = vadd.f32 %v1578_v26, %v1941_v52  ;;  %v581_v4 = vsel %vm374_vm1, %v1970_v0, -inf  ;;  %v1987_v7 = vadd.f32 %v1943_v53, %v1578_v26  ;;  %v611_v10 = vsel %vm374_vm1, %v1990_v8, -inf }
  0xff   : > { %3314 = vst [vmem:[#allocation16_spill] sm:$0xff] %v1950_v56  ;;  %594 = vmax.xlane.f32.xlu0 %v593_v55  ;;  %v590_v61 = vsel %vm374_vm1, %v1953_v57, -inf  ;;  %v1973_v1 = vadd.f32 %v1578_v26, %v1950_v56  ;;  %v605_v6 = vsel %vm374_vm1, %v1976_v2, -inf }
 0x100   : > { %v584_v3 = vsel %vm374_vm1, %v1967_v63, -inf  ;;  %v614_v9 = vsel %vm374_vm1, %v1987_v7, -inf }
 0x101   : > { %v608_v5 = vsel %vm374_vm1, %v1973_v1, -inf }
 0x102   : > { %597 = vmax.xlane.f32.xlu1 %v596_v59 }
 0x103   : > { %573 = vmax.xlane.f32.xlu0 %v572_v60 }
 0x106   : > { %591 = vmax.xlane.f32.xlu1 %v590_v61 }
 0x107   : > { %588 = vmax.xlane.f32.xlu0 %v587_v62 }
 0x10a   : > { %585 = vmax.xlane.f32.xlu1 %v584_v3 }
 0x10b   : > { %582 = vmax.xlane.f32.xlu0 %v581_v4 }
 0x10e   : > { %609 = vmax.xlane.f32.xlu1 %v608_v5 }
 0x10f   : > { %606 = vmax.xlane.f32.xlu0 %v605_v6 }
 0x112   : > { %615 = vmax.xlane.f32.xlu1 %v614_v9 }
 0x113   : > { %612 = vmax.xlane.f32.xlu0 %v611_v10 }
 0x183   : > { %v577_v13 = vpop.xlane.xlu1 %576 }
 0x184   : > { %v601_v14 = vpop.xlane.xlu0 %600  ;;  %vm619_vm2 = vcmp.eq.f32.partialorder %v1887_v28, %v577_v13 }
 0x185   : > { %vm627_vm3 = vcmp.eq.f32.partialorder %v1894_v31, %v601_v14  ;;  %v635_v15 = vsel %vm619_vm2, %v1996_v12, 8 }
 0x186   : > { %v643_v16 = vsel %vm627_vm3, %v1996_v12, 8  ;;  %v2003_v17 = vsel %vm374_vm1, %v635_v15, 2147483647 }
 0x187   : > { %v580_v18 = vpop.xlane.xlu1 %579  ;;  %v681_v19 = vshra.s32 %v2003_v17, 16  ;;  %v2007_v20 = vsel %vm374_vm1, %v643_v16, 2147483647 }
 0x188   : > { %v571_v21 = vpop.xlane.xlu0 %570  ;;  %vm620_vm4 = vcmp.eq.f32.partialorder %v1901_v34, %v580_v18  ;;  %v801_v24 = vshra.s32 %v2007_v20, 16 }
 0x189   : > { %vm617_vm5 = vcmp.eq.f32.partialorder %v1910_v38, %v571_v21  ;;  %v636_v22 = vsel %vm620_vm4, %v1996_v12, 8  ;;  %v2012_v23 = vcvt.s32.f32 %v681_v19 }
 0x18a   : > { %v633_v25 = vsel %vm617_vm5, %v1996_v12, 8  ;;  %v2017_v26 = vsel %vm374_vm1, %v636_v22, 2147483647  ;;  %v2028_v59 = vcvt.s32.f32 %v801_v24 }
 0x18b   : > { %v604_v37 = vpop.xlane.xlu1 %603  ;;  %684 = vmin.xlane.f32.xlu0 %v2012_v23  ;;  %v696_v40 = vshra.s32 %v2017_v26, 16  ;;  %v2022_v42 = vsel %vm374_vm1, %v633_v25, 2147483647 }
 0x18c   : > { %v595_v44 = vpop.xlane.xlu0 %594  ;;  %vm628_vm6 = vcmp.eq.f32.partialorder %v1917_v41, %v604_v37  ;;  %v651_v51 = vshra.s32 %v2022_v42, 16 }
 0x18d   : > { %vm625_vm7 = vcmp.eq.f32.partialorder %v1922_v43, %v595_v44  ;;  %v644_v55 = vsel %vm628_vm6, %v1996_v12, 8  ;;  %v2030_v60 = vcvt.s32.f32 %v696_v40 }
 0x18e   : > { %v641_v61 = vsel %vm625_vm7, %v1996_v12, 8  ;;  %v2034_v62 = vsel %vm374_vm1, %v644_v55, 2147483647  ;;  %v2043_v9 = vcvt.s32.f32 %v651_v51 }
 0x18f   : > { %v598_v3 = vpop.xlane.xlu1 %597  ;;  %804 = vmin.xlane.f32.xlu0 %v2028_v59  ;;  %699 = vmin.xlane.f32.xlu1 %v2030_v60  ;;  %v816_v4 = vshra.s32 %v2034_v62, 16  ;;  %v2040_v5 = vsel %vm374_vm1, %v641_v61, 2147483647  ;;  %v815_v33 = vand.u32 65535, %v2034_v62 }
 0x190   : > { %vm626_vm8 = vcmp.eq.f32.partialorder %v1937_v50, %v598_v3  ;;  %v574_v6 = vpop.xlane.xlu0 %573  ;;  %v771_v13 = vshra.s32 %v2040_v5, 16 }
 0x191   : > { %v642_v10 = vsel %vm626_vm8, %v1996_v12, 8  ;;  %vm618_vm9 = vcmp.eq.f32.partialorder %v1946_v54, %v574_v6  ;;  %v2047_v11 = vcvt.s32.f32 %v816_v4 }
 0x192   : > { %v634_v14 = vsel %vm618_vm9, %v1996_v12, 8  ;;  %v2057_v18 = vsel %vm374_vm1, %v642_v10, 2147483647  ;;  %v2063_v24 = vcvt.s32.f32 %v771_v13 }
 0x193   : > { %654 = vmin.xlane.f32.xlu0 %v2043_v9  ;;  %v592_v15 = vpop.xlane.xlu1 %591  ;;  %819 = vmin.xlane.f32.xlu1 %v2047_v11  ;;  %v2054_v16 = vsel %vm374_vm1, %v634_v14, 2147483647  ;;  %v786_v40 = vshra.s32 %v2057_v18, 16 }
 0x194   : > { %v589_v19 = vpop.xlane.xlu0 %588  ;;  %vm624_vm10 = vcmp.eq.f32.partialorder %v1953_v57, %v592_v15  ;;  %v666_v21 = vshra.s32 %v2054_v16, 16 }
 0x195   : > { %vm623_vm11 = vcmp.eq.f32.partialorder %v1956_v58, %v589_v19  ;;  %v640_v22 = vsel %vm624_vm10, %v1996_v12, 8  ;;  %v2084_v13 = vcvt.s32.f32 %v786_v40 }
 0x196   : > { %v639_v25 = vsel %vm623_vm11, %v1996_v12, 8  ;;  %v2066_v37 = vcvt.s32.f32 %v666_v21  ;;  %v2074_v55 = vsel %vm374_vm1, %v640_v22, 2147483647 }
 0x197   : > { %774 = vmin.xlane.f32.xlu0 %v2063_v24  ;;  %v586_v44 = vpop.xlane.xlu1 %585  ;;  %v2071_v51 = vsel %vm374_vm1, %v639_v25, 2147483647  ;;  %v756_v14 = vshra.s32 %v2074_v55, 16 }
 0x198   : > { %v583_v61 = vpop.xlane.xlu0 %582  ;;  %669 = vmin.xlane.f32.xlu1 %v2066_v37  ;;  %vm622_vm12 = vcmp.eq.f32.partialorder %v1967_v63, %v586_v44  ;;  %v741_v3 = vshra.s32 %v2071_v51, 16 }
 0x199   : > { %vm621_vm13 = vcmp.eq.f32.partialorder %v1970_v0, %v583_v61  ;;  %v638_v4 = vsel %vm622_vm12, %v1996_v12, 8 }
 0x19a   : > { %v637_v6 = vsel %vm621_vm13, %v1996_v12, 8  ;;  %v2082_v10 = vcvt.s32.f32 %v741_v3  ;;  %v2091_v21 = vsel %vm374_vm1, %v638_v4, 2147483647  ;;  %v2102_v3 = vcvt.s32.f32 %v756_v14 }
 0x19b   : > { %v610_v15 = vpop.xlane.xlu1 %609  ;;  %v2088_v19 = vsel %vm374_vm1, %v637_v6, 2147483647  ;;  %v726_v4 = vshra.s32 %v2091_v21, 16 }
 0x19c   : > { %744 = vmin.xlane.f32.xlu0 %v2082_v10  ;;  %v607_v22 = vpop.xlane.xlu0 %606  ;;  %789 = vmin.xlane.f32.xlu1 %v2084_v13  ;;  %vm630_vm14 = vcmp.eq.f32.partialorder %v1973_v1, %v610_v15  ;;  %v711_v25 = vshra.s32 %v2088_v19, 16 }
 0x19d   : > { %vm629_vm15 = vcmp.eq.f32.partialorder %v1976_v2, %v607_v22  ;;  %v646_v40 = vsel %vm630_vm14, %v1996_v12, 8  ;;  %v2120_v47 = vcvt.s32.f32 %v726_v4 }
 0x19e   : > { %v645_v44 = vsel %vm629_vm15, %v1996_v12, 8  ;;  %v2100_v61 = vcvt.s32.f32 %v711_v25  ;;  %v2109_v15 = vsel %vm374_vm1, %v646_v40, 2147483647 }
 0x19f   : > { %v616_v6 = vpop.xlane.xlu1 %615  ;;  %v2106_v53 = vsel %vm374_vm1, %v645_v44, 2147483647  ;;  %v846_v40 = vshra.s32 %v2109_v15, 16 }
 0x1a0   : > { %714 = vmin.xlane.f32.xlu0 %v2100_v61  ;;  %v613_v22 = vpop.xlane.xlu0 %612  ;;  %759 = vmin.xlane.f32.xlu1 %v2102_v3  ;;  %vm632_vm0 = vcmp.eq.f32.partialorder %v1987_v7, %v616_v6  ;;  %v831_v25 = vshra.s32 %v2106_v53, 16 }
 0x1a1   : > { %vm631_vm2 = vcmp.eq.f32.partialorder %v1990_v8, %v613_v22  ;;  %v648_v14 = vsel %vm632_vm0, %v1996_v12, 8 }
 0x1a2   : > { %v647_v56 = vsel %vm631_vm2, %v1996_v12, 8  ;;  %v2118_v44 = vcvt.s32.f32 %v831_v25  ;;  %v2127_v49 = vsel %vm374_vm1, %v648_v14, 2147483647  ;;  %v2134_v25 = vcvt.s32.f32 %v846_v40 }
 0x1a3   : > { %v2124_v35 = vsel %vm374_vm1, %v647_v56, 2147483647  ;;  %v876_v4 = vshra.s32 %v2127_v49, 16  ;;  %v680_v14 = vand.u32 65535, %v2003_v17  ;;  %v695_v40 = vand.u32 65535, %v2017_v26 }
 0x1a4   : > { %834 = vmin.xlane.f32.xlu0 %v2118_v44  ;;  %729 = vmin.xlane.f32.xlu1 %v2120_v47  ;;  %v861_v6 = vshra.s32 %v2124_v35, 16  ;;  %v650_v17 = vand.u32 65535, %v2022_v42  ;;  %v770_v42 = vand.u32 65535, %v2040_v5  ;;  %v740_v5 = vand.u32 65535, %v2071_v51 }
 0x1a5   : > { %v2139_v56 = vcvt.s32.f32 %v876_v4  ;;  %v682_v29 = vcvt.s32.f32 %v680_v14  ;;  %v697_v45 = vcvt.s32.f32 %v695_v40  ;;  %v817_v14 = vcvt.s32.f32 %v815_v33 }
 0x1a6   : > { %v2132_v22 = vcvt.s32.f32 %v861_v6  ;;  %v800_v6 = vand.u32 65535, %v2007_v20  ;;  %v652_v26 = vcvt.s32.f32 %v650_v17  ;;  %v772_v62 = vcvt.s32.f32 %v770_v42 }
 0x1a8   : > { %864 = vmin.xlane.f32.xlu0 %v2132_v22  ;;  %849 = vmin.xlane.f32.xlu1 %v2134_v25  ;;  %v802_v52 = vcvt.s32.f32 %v800_v6 }
 0x1ac   : > { %879 = vmin.xlane.f32.xlu1 %v2139_v56 }
 0x218   : > { %v2143_v39 = vpop.xlane.xlu0 %684 }
 0x219   : > { %vm686_vm3 = vcmp.eq.f32.partialorder %v2012_v23, %v2143_v39 }
 0x21a   : > { %v687_v48 = vsel %vm686_vm3, %v682_v29, inf }
 0x21b   : > { %688 = vmin.xlane.f32.xlu0 %v687_v48 }
 0x21c   : > { %v2149_v32 = vpop.xlane.xlu0 %804  ;;  %v2151_v4 = vpop.xlane.xlu1 %699 }
 0x21d   : > { %vm806_vm4 = vcmp.eq.f32.partialorder %v2028_v59, %v2149_v32  ;;  %vm701_vm5 = vcmp.eq.f32.partialorder %v2030_v60, %v2151_v4  ;;  %v665_v59 = vand.u32 65535, %v2054_v16 }
 0x21e   : > { %v807_v20 = vsel %vm806_vm4, %v802_v52, inf  ;;  %v702_v23 = vsel %vm701_vm5, %v697_v45, inf }
 0x21f   : > { %808 = vmin.xlane.f32.xlu0 %v807_v20  ;;  %703 = vmin.xlane.f32.xlu1 %v702_v23  ;;  %v667_v33 = vcvt.s32.f32 %v665_v59  ;;  %v742_v20 = vcvt.s32.f32 %v740_v5 }
 0x220   : > { %v2159_v29 = vpop.xlane.xlu0 %654  ;;  %v2161_v48 = vpop.xlane.xlu1 %819 }
 0x221   : > { %vm656_vm6 = vcmp.eq.f32.partialorder %v2043_v9, %v2159_v29  ;;  %vm821_vm7 = vcmp.eq.f32.partialorder %v2047_v11, %v2161_v48  ;;  %v785_v9 = vand.u32 65535, %v2057_v18 }
 0x222   : > { %v657_v52 = vsel %vm656_vm6, %v652_v26, inf  ;;  %v822_v45 = vsel %vm821_vm7, %v817_v14, inf  ;;  %v755_v26 = vand.u32 65535, %v2074_v55  ;;  %v725_v55 = vand.u32 65535, %v2091_v21 }
 0x223   : > { %658 = vmin.xlane.f32.xlu0 %v657_v52  ;;  %823 = vmin.xlane.f32.xlu1 %v822_v45  ;;  %v787_v23 = vcvt.s32.f32 %v785_v9  ;;  %v845_v21 = vand.u32 65535, %v2109_v15 }
 0x224   : > { %v2169_v60 = vpop.xlane.xlu0 %774  ;;  %v757_v59 = vcvt.s32.f32 %v755_v26 }
 0x225   : > { %v2171_v6 = vpop.xlane.xlu1 %669  ;;  %vm776_vm8 = vcmp.eq.f32.partialorder %v2063_v24, %v2169_v60  ;;  %v710_v24 = vand.u32 65535, %v2088_v19  ;;  %v830_v19 = vand.u32 65535, %v2106_v53  ;;  %v860_v53 = vand.u32 65535, %v2124_v35 }
 0x226   : > { %v777_v11 = vsel %vm776_vm8, %v772_v62, inf  ;;  %vm671_vm9 = vcmp.eq.f32.partialorder %v2066_v37, %v2171_v6  ;;  %v875_v35 = vand.u32 65535, %v2127_v49  ;;  %v691_v49 = vcvt.f32.s32 %v2143_v39 }
 0x227   : > { %778 = vmin.xlane.f32.xlu0 %v777_v11  ;;  %v672_v16 = vsel %vm671_vm9, %v667_v33, inf  ;;  %v712_v42 = vcvt.s32.f32 %v710_v24  ;;  %v832_v62 = vcvt.s32.f32 %v830_v19  ;;  %v727_v33 = vcvt.s32.f32 %v725_v55 }
 0x228   : > { %673 = vmin.xlane.f32.xlu1 %v672_v16  ;;  %v862_v11 = vcvt.s32.f32 %v860_v53  ;;  %v847_v16 = vcvt.s32.f32 %v845_v21  ;;  %v811_v24 = vcvt.f32.s32 %v2149_v32  ;;  %v661_v19 = vcvt.f32.s32 %v2159_v29 }
 0x229   : > { %v2179_v40 = vpop.xlane.xlu0 %744  ;;  %v2181_v17 = vpop.xlane.xlu1 %789 }
 0x22a   : > { %vm746_vm10 = vcmp.eq.f32.partialorder %v2082_v10, %v2179_v40  ;;  %vm791_vm11 = vcmp.eq.f32.partialorder %v2084_v13, %v2181_v17  ;;  %v662_v21 = vshll.u32 %v661_v19, 16 }
 0x22b   : > { %v747_v18 = vsel %vm746_vm10, %v742_v20, inf  ;;  %v792_v37 = vsel %vm791_vm11, %v787_v23, inf  ;;  %v877_v20 = vcvt.s32.f32 %v875_v35 }
 0x22c   : > { %748 = vmin.xlane.f32.xlu0 %v747_v18  ;;  %793 = vmin.xlane.f32.xlu1 %v792_v37 }
 0x22d   : > { %v2189_v51 = vpop.xlane.xlu0 %714  ;;  %v2191_v14 = vpop.xlane.xlu1 %759 }
 0x22e   : > { %vm716_vm12 = vcmp.eq.f32.partialorder %v2100_v61, %v2189_v51  ;;  %vm761_vm13 = vcmp.eq.f32.partialorder %v2102_v3, %v2191_v14 }
 0x22f   : > { %v717_v10 = vsel %vm716_vm12, %v712_v42, inf  ;;  %v762_v13 = vsel %vm761_vm13, %v757_v59, inf  ;;  %v812_v42 = vshll.u32 %v811_v24, 16  ;;  %v796_v24 = vcvt.f32.s32 %v2181_v17 }
 0x230   : > { %718 = vmin.xlane.f32.xlu0 %v717_v10  ;;  %763 = vmin.xlane.f32.xlu1 %v762_v13 }
 0x231   : > { %v2199_v52 = vpop.xlane.xlu0 %834  ;;  %v2201_v45 = vpop.xlane.xlu1 %729  ;;  %v797_v19 = vshll.u32 %v796_v24, 16 }
 0x232   : > { %vm836_vm14 = vcmp.eq.f32.partialorder %v2118_v44, %v2199_v52  ;;  %vm731_vm15 = vcmp.eq.f32.partialorder %v2120_v47, %v2201_v45 }
 0x233   : > { %v837_v61 = vsel %vm836_vm14, %v832_v62, inf  ;;  %v732_v3 = vsel %vm731_vm15, %v727_v33, inf }
 0x234   : > { %838 = vmin.xlane.f32.xlu0 %v837_v61  ;;  %733 = vmin.xlane.f32.xlu1 %v732_v3 }
 0x235   : > { %v2209_v5 = vpop.xlane.xlu0 %864  ;;  %v2211_v9 = vpop.xlane.xlu1 %849 }
 0x236   : > { %vm866_vm0 = vcmp.eq.f32.partialorder %v2132_v22, %v2209_v5  ;;  %vm851_vm2 = vcmp.eq.f32.partialorder %v2134_v25, %v2211_v9  ;;  %v706_v22 = vcvt.f32.s32 %v2151_v4  ;;  %v692_v25 = vshll.u32 %v691_v49, 16 }
 0x237   : > { %v867_v15 = vsel %vm866_vm0, %v862_v11, inf  ;;  %v852_v47 = vsel %vm851_vm2, %v847_v16, inf  ;;  %v676_v16 = vcvt.f32.s32 %v2171_v6  ;;  %v751_v49 = vcvt.f32.s32 %v2179_v40 }
 0x238   : > { %868 = vmin.xlane.f32.xlu0 %v867_v15  ;;  %853 = vmin.xlane.f32.xlu1 %v852_v47  ;;  %v707_v59 = vshll.u32 %v706_v22, 16 }
 0x239   : > { %v2218_v44 = vpop.xlane.xlu1 %879 }
 0x23a   : > { %vm881_vm3 = vcmp.eq.f32.partialorder %v2139_v56, %v2218_v44  ;;  %v826_v56 = vcvt.f32.s32 %v2161_v48  ;;  %v781_v48 = vcvt.f32.s32 %v2169_v60 }
 0x23b   : > { %v882_v23 = vsel %vm881_vm3, %v877_v20, inf }
 0x23c   : > { %883 = vmin.xlane.f32.xlu1 %v882_v23  ;;  %v827_v61 = vshll.u32 %v826_v56, 16  ;;  %v782_v15 = vshll.u32 %v781_v48, 16 }
 0x2a8   : > { %v689_v26 = vpop.xlane.xlu0 %688 }
 0x2a9   : > { %v690_v18 = vcvt.f32.s32 %v689_v26 }
 0x2ab   : > { %v2225_v37 = vadd.s32 %v692_v25, %v690_v18 }
 0x2ac   : > { %v809_v55 = vpop.xlane.xlu0 %808  ;;  %v704_v10 = vpop.xlane.xlu1 %703 }
 0x2ad   : > { %v810_v13 = vcvt.f32.s32 %v809_v55  ;;  %v705_v62 = vcvt.f32.s32 %v704_v10  ;;  %vm891_vm4 = vcmp.eq.s32.totalorder %v1996_v12, %v2225_v37  ;;  %v721_v55 = vcvt.f32.s32 %v2189_v51 }
 0x2ae   : > { %v2235_v32 = vsel %vm891_vm4, -1e+30, %v1887_v28 }
 0x2af   : > { %v2237_v39 = vadd.s32 %v812_v42, %v810_v13  ;;  %v2239_v4 = vadd.s32 %v707_v59, %v705_v62  ;;  %v1041_v29 = vsel %vm374_vm1, %v2235_v32, -inf  ;;  %v752_v59 = vshll.u32 %v751_v49, 16 }
 0x2b0   : > { %1042 = vmax.xlane.f32.xlu0 %v1041_v29  ;;  %v659_v33 = vpop.xlane.xlu0 %658  ;;  %v824_v53 = vpop.xlane.xlu1 %823  ;;  %v766_v13 = vcvt.f32.s32 %v2191_v14  ;;  %v871_v49 = vcvt.f32.s32 %v2209_v5 }
 0x2b1   : > { %3315 = vst [vmem:[#allocation17_spill] sm:$0xff] %v2237_v39  ;;  %3316 = vst [vmem:[#allocation18_spill] sm:$0xff] %v2239_v4  ;;  %v660_v3 = vcvt.f32.s32 %v659_v33  ;;  %v825_v11 = vcvt.f32.s32 %v824_v53  ;;  %vm899_vm5 = vcmp.eq.s32.totalorder %v1996_v12, %v2237_v39  ;;  %vm892_vm6 = vcmp.eq.s32.totalorder %v1996_v12, %v2239_v4 }
 0x2b2   : > { %v2257_v60 = vsel %vm899_vm5, -1e+30, %v1894_v31  ;;  %v2263_v6 = vsel %vm892_vm6, -1e+30, %v1901_v34  ;;  %v677_v34 = vshll.u32 %v676_v16, 16  ;;  %v722_v53 = vshll.u32 %v721_v55, 16 }
 0x2b3   : > { %v2249_v28 = vadd.s32 %v662_v21, %v660_v3  ;;  %v2251_v35 = vadd.s32 %v827_v61, %v825_v11  ;;  %v1065_v47 = vsel %vm374_vm1, %v2257_v60, -inf  ;;  %v1044_v23 = vsel %vm374_vm1, %v2263_v6, -inf }
 0x2b4   : > { %v779_v20 = vpop.xlane.xlu0 %778  ;;  %1066 = vmax.xlane.f32.xlu0 %v1065_v47  ;;  %1045 = vmax.xlane.f32.xlu1 %v1044_v23  ;;  %v767_v11 = vshll.u32 %v766_v13, 16  ;;  %v736_v16 = vcvt.f32.s32 %v2201_v45 }
 0x2b5   : > { %3317 = vst [vmem:[#allocation19_spill] sm:$0xff] %v2251_v35  ;;  %v780_v31 = vcvt.f32.s32 %v779_v20  ;;  %v674_v22 = vpop.xlane.xlu1 %673  ;;  %vm889_vm7 = vcmp.eq.s32.totalorder %v1996_v12, %v2249_v28  ;;  %vm3270_vm8 = vcmp.eq.s32.totalorder %v1996_v12, %v2251_v35 }
 0x2b6   : > { %v675_v26 = vcvt.f32.s32 %v674_v22  ;;  %v2277_v25 = vsel %vm889_vm7, -1e+30, %v1910_v38  ;;  %v2289_v18 = vsel %vm3270_vm8, -1e+30, %v1917_v41 }
 0x2b7   : > { %v2281_v40 = vadd.s32 %v782_v15, %v780_v31  ;;  %v1035_v17 = vsel %vm374_vm1, %v2277_v25, -inf  ;;  %v1068_v38 = vsel %vm374_vm1, %v2289_v18, -inf }
 0x2b8   : > { %v2291_v42 = vadd.s32 %v677_v34, %v675_v26  ;;  %1036 = vmax.xlane.f32.xlu0 %v1035_v17  ;;  %1069 = vmax.xlane.f32.xlu1 %v1068_v38  ;;  %v737_v26 = vshll.u32 %v736_v16, 16 }
 0x2b9   : > { %3318 = vst [vmem:[#allocation20_spill] sm:$0xff] %v2281_v40  ;;  %v749_v10 = vpop.xlane.xlu0 %748  ;;  %v794_v56 = vpop.xlane.xlu1 %793  ;;  %vm897_vm9 = vcmp.eq.s32.totalorder %v1996_v12, %v2281_v40 }
 0x2ba   : > { %3319 = vst [vmem:[#allocation21_spill] sm:$0xff] %v2291_v42  ;;  %v750_v41 = vcvt.f32.s32 %v749_v10  ;;  %v795_v62 = vcvt.f32.s32 %v794_v56  ;;  %v2303_v29 = vsel %vm897_vm9, -1e+30, %v1922_v43  ;;  %vm890_vm10 = vcmp.eq.s32.totalorder %v1996_v12, %v2291_v42 }
 0x2bb   : > { %v1059_v51 = vsel %vm374_vm1, %v2303_v29, -inf  ;;  %v2317_v14 = vsel %vm890_vm10, -1e+30, %v1946_v54  ;;  %v841_v43 = vcvt.f32.s32 %v2199_v52 }
 0x2bc   : > { %v2309_v48 = vadd.s32 %v752_v59, %v750_v41  ;;  %v2311_v33 = vadd.s32 %v797_v19, %v795_v62  ;;  %1060 = vmax.xlane.f32.xlu0 %v1059_v51  ;;  %v1038_v61 = vsel %vm374_vm1, %v2317_v14, -inf  ;;  %v872_v19 = vshll.u32 %v871_v49, 16 }
 0x2bd   : > { %v719_v21 = vpop.xlane.xlu0 %718  ;;  %v764_v3 = vpop.xlane.xlu1 %763  ;;  %1039 = vmax.xlane.f32.xlu1 %v1038_v61  ;;  %v842_v23 = vshll.u32 %v841_v43, 16  ;;  %v886_v62 = vcvt.f32.s32 %v2218_v44 }
 0x2be   : > { %3320 = vst [vmem:[#allocation22_spill] sm:$0xff] %v2309_v48  ;;  %3321 = vst [vmem:[#allocation23_spill] sm:$0xff] %v2311_v33  ;;  %v720_v15 = vcvt.f32.s32 %v719_v21  ;;  %v765_v47 = vcvt.f32.s32 %v764_v3  ;;  %vm895_vm11 = vcmp.eq.s32.totalorder %v1996_v12, %v2309_v48  ;;  %vm898_vm12 = vcmp.eq.s32.totalorder %v1996_v12, %v2311_v33 }
 0x2bf   : > { %v2335_v20 = vsel %vm895_vm11, -1e+30, %v1956_v58  ;;  %v2341_v45 = vsel %vm898_vm12, -1e+30, %v1937_v50  ;;  %v856_v58 = vcvt.f32.s32 %v2211_v9 }
 0x2c0   : > { %v2327_v54 = vadd.s32 %v722_v53, %v720_v15  ;;  %v2329_v52 = vadd.s32 %v767_v11, %v765_v47  ;;  %v1053_v24 = vsel %vm374_vm1, %v2335_v20, -inf  ;;  %v1062_v22 = vsel %vm374_vm1, %v2341_v45, -inf }
 0x2c1   : > { %v839_v31 = vpop.xlane.xlu0 %838  ;;  %v734_v34 = vpop.xlane.xlu1 %733  ;;  %1054 = vmax.xlane.f32.xlu0 %v1053_v24  ;;  %1063 = vmax.xlane.f32.xlu1 %v1062_v22  ;;  %v857_v41 = vshll.u32 %v856_v58, 16  ;;  %v887_v11 = vshll.u32 %v886_v62, 16  ;;  %v381_v24 = vsel %vm374_vm1, %v1884_v27, -inf  ;;  %v3329_v22 = vld [vmem:[#allocation7_spill] sm:$0xff]  ;;  %v3335_v62 = vld [vmem:[#allocation9_spill] sm:$0xff] }
 0x2c2   : > { %3322 = vst [vmem:[#allocation24_spill] sm:$0xff] %v2327_v54  ;;  %3323 = vst [vmem:[#allocation25_spill] sm:$0xff] %v2329_v52  ;;  %v840_v17 = vcvt.f32.s32 %v839_v31  ;;  %v735_v38 = vcvt.f32.s32 %v734_v34  ;;  %vm893_vm13 = vcmp.eq.s32.totalorder %v1996_v12, %v2327_v54  ;;  %vm896_vm14 = vcmp.eq.s32.totalorder %v1996_v12, %v2329_v52 }
 0x2c3   : > { %v2361_v59 = vsel %vm893_vm13, -1e+30, %v1970_v0  ;;  %v2367_v9 = vsel %vm896_vm14, -1e+30, %v1953_v57  ;;  %v378_v31 = vsel %vm374_vm1, %v1905_v36, -inf  ;;  %v384_v34 = vsel %vm374_vm1, %v3329_v22, -inf }
 0x2c4   : > { %v2353_v50 = vadd.s32 %v842_v23, %v840_v17  ;;  %v2355_v5 = vadd.s32 %v737_v26, %v735_v38  ;;  %v1047_v55 = vsel %vm374_vm1, %v2361_v59, -inf  ;;  %v1056_v56 = vsel %vm374_vm1, %v2367_v9, -inf  ;;  %v3330_v26 = vld [vmem:[#allocation10_spill] sm:$0xff] }
 0x2c5   : > { %v869_v10 = vpop.xlane.xlu0 %868  ;;  %v854_v13 = vpop.xlane.xlu1 %853  ;;  %1048 = vmax.xlane.f32.xlu0 %v1047_v55  ;;  %1057 = vmax.xlane.f32.xlu1 %v1056_v56  ;;  %v393_v58 = vsel %vm374_vm1, %v3330_v26, -inf  ;;  %v3331_v17 = vld [vmem:[#allocation14_spill] sm:$0xff] }
 0x2c6   : > { %3324 = vst [vmem:[#allocation26_spill] sm:$0xff] %v2353_v50  ;;  %3325 = vst [vmem:[#allocation27_spill] sm:$0xff] %v2355_v5  ;;  %v870_v0 = vcvt.f32.s32 %v869_v10  ;;  %v855_v51 = vcvt.f32.s32 %v854_v13  ;;  %vm3299_vm15 = vcmp.eq.s32.totalorder %v1996_v12, %v2353_v50  ;;  %vm894_vm0 = vcmp.eq.s32.totalorder %v1996_v12, %v2355_v5  ;;  %v3333_v10 = vld [vmem:[#allocation12_spill] sm:$0xff]  ;;  %v3334_v13 = vld [vmem:[#allocation5_spill] sm:$0xff] }
 0x2c7   : > { %v2386_v43 = vsel %vm3299_vm15, -1e+30, %v1976_v2  ;;  %v2392_v44 = vsel %vm894_vm0, -1e+30, %v1967_v63  ;;  %v390_v38 = vsel %vm374_vm1, %v3331_v17, -inf  ;;  %v396_v56 = vsel %vm374_vm1, %v3333_v10, -inf }
 0x2c8   : > { %v2378_v57 = vadd.s32 %v872_v19, %v870_v0  ;;  %v2380_v53 = vadd.s32 %v857_v41, %v855_v51  ;;  %v1071_v21 = vsel %vm374_vm1, %v2386_v43, -inf  ;;  %v1050_v61 = vsel %vm374_vm1, %v2392_v44, -inf  ;;  %v3332_v19 = vld [vmem:[#allocation6_spill] sm:$0xff]  ;;  %v3336_v51 = vld [vmem:[#allocation13_spill] sm:$0xff] }
 0x2c9   : > { %v884_v3 = vpop.xlane.xlu1 %883  ;;  %1072 = vmax.xlane.f32.xlu0 %v1071_v21  ;;  %1051 = vmax.xlane.f32.xlu1 %v1050_v61  ;;  %v399_v55 = vsel %vm374_vm1, %v3332_v19, -inf  ;;  %v405_v41 = vsel %vm374_vm1, %v3334_v13, -inf  ;;  %v402_v0 = vsel %vm374_vm1, %v3335_v62, -inf  ;;  %v411_v21 = vsel %vm374_vm1, %v3336_v51, -inf  ;;  %v3337_v61 = vld [vmem:[#allocation8_spill] sm:$0xff] }
 0x2ca   : > { %3326 = vst [vmem:[#allocation28_spill] sm:$0xff] %v2378_v57  ;;  %3327 = vst [vmem:[#allocation29_spill] sm:$0xff] %v2380_v53  ;;  %v885_v16 = vcvt.f32.s32 %v884_v3  ;;  %vm3267_vm2 = vcmp.eq.s32.totalorder %v1996_v12, %v2378_v57  ;;  %vm3269_vm3 = vcmp.eq.s32.totalorder %v1996_v12, %v2380_v53  ;;  %v408_v3 = vsel %vm374_vm1, %v3337_v61, -inf }
 0x2cb   : > { %v2404_v63 = vsel %vm3267_vm2, -1e+30, %v1990_v8  ;;  %v2416_v47 = vsel %vm3269_vm3, -1e+30, %v1973_v1  ;;  %v375_v1 = vsel %vm374_vm1, %v1891_v30, -inf }
 0x2cc   : > { %v2408_v2 = vadd.s32 %v887_v11, %v885_v16  ;;  %v1077_v15 = vsel %vm374_vm1, %v2404_v63, -inf  ;;  %v1074_v23 = vsel %vm374_vm1, %v2416_v47, -inf  ;;  %v3338_v11 = vld [vmem:[#allocation11_spill] sm:$0xff] }
 0x2cd   : > { %1078 = vmax.xlane.f32.xlu0 %v1077_v15  ;;  %1075 = vmax.xlane.f32.xlu1 %v1074_v23  ;;  %v417_v16 = vsel %vm374_vm1, %v3338_v11, -inf  ;;  %v3339_v15 = vld [vmem:[#allocation16_spill] sm:$0xff] }
 0x2ce   : > { %3328 = vst [vmem:[#allocation30_spill] sm:$0xff] %v2408_v2  ;;  %vm3268_vm2 = vcmp.eq.s32.totalorder %v1996_v12, %v2408_v2  ;;  %v414_v23 = vsel %vm374_vm1, %v3339_v15, -inf }
 0x2cf   : > { %v2426_v8 = vsel %vm3268_vm2, -1e+30, %v1987_v7  ;;  %v387_v7 = vsel %vm374_vm1, %v1928_v46, -inf }
 0x2d0   : > { %v1080_v49 = vsel %vm374_vm1, %v2426_v8, -inf }
 0x2d1   : > { %376 = vmax.xlane.f32.xlu0 %v375_v1  ;;  %1081 = vmax.xlane.f32.xlu1 %v1080_v49  ;;  %v3340_v49 = vld [vmem:[#allocation15_spill] sm:$0xff] }
 0x2d2   : > { %v420_v1 = vsel %vm374_vm1, %v3340_v49, -inf }
 0x2d5   : > { %382 = vmax.xlane.f32.xlu0 %v381_v24  ;;  %379 = vmax.xlane.f32.xlu1 %v378_v31 }
 0x2d9   : > { %388 = vmax.xlane.f32.xlu0 %v387_v7  ;;  %385 = vmax.xlane.f32.xlu1 %v384_v34 }
 0x2dd   : > { %394 = vmax.xlane.f32.xlu0 %v393_v58  ;;  %391 = vmax.xlane.f32.xlu1 %v390_v38 }
 0x2e1   : > { %400 = vmax.xlane.f32.xlu0 %v399_v55  ;;  %397 = vmax.xlane.f32.xlu1 %v396_v56 }
 0x2e5   : > { %406 = vmax.xlane.f32.xlu0 %v405_v41  ;;  %403 = vmax.xlane.f32.xlu1 %v402_v0 }
 0x2e9   : > { %412 = vmax.xlane.f32.xlu0 %v411_v21  ;;  %409 = vmax.xlane.f32.xlu1 %v408_v3 }
 0x2ed   : > { %418 = vmax.xlane.f32.xlu0 %v417_v16  ;;  %415 = vmax.xlane.f32.xlu1 %v414_v23 }
 0x2f1   : > { %421 = vmax.xlane.f32.xlu1 %v420_v1 }
 0x33d   : > { %v1043_v24 = vpop.xlane.xlu0 %1042 }
 0x33e   : > { %vm1085_vm2 = vcmp.eq.f32.partialorder %v2235_v32, %v1043_v24 }
 0x33f   : > { %v1101_v31 = vsel %vm1085_vm2, %v1996_v12, 8 }
 0x340   : > { %v2465_v7 = vsel %vm374_vm1, %v1101_v31, 2147483647 }
 0x341   : > { %v1147_v34 = vshra.s32 %v2465_v7, 16  ;;  %v1067_v58 = vpop.xlane.xlu0 %1066  ;;  %v1046_v38 = vpop.xlane.xlu1 %1045 }
 0x342   : > { %vm1093_vm3 = vcmp.eq.f32.partialorder %v2257_v60, %v1067_v58  ;;  %vm1086_vm8 = vcmp.eq.f32.partialorder %v2263_v6, %v1046_v38 }
 0x343   : > { %v2470_v55 = vcvt.s32.f32 %v1147_v34  ;;  %v1109_v56 = vsel %vm1093_vm3, %v1996_v12, 8  ;;  %v1102_v41 = vsel %vm1086_vm8, %v1996_v12, 8 }
 0x344   : > { %v2476_v32 = vsel %vm374_vm1, %v1109_v56, 2147483647  ;;  %v2479_v0 = vsel %vm374_vm1, %v1102_v41, 2147483647 }
 0x345   : > { %1150 = vmin.xlane.f32.xlu0 %v2470_v55  ;;  %v1037_v21 = vpop.xlane.xlu0 %1036  ;;  %v1070_v3 = vpop.xlane.xlu1 %1069  ;;  %v1267_v60 = vshra.s32 %v2476_v32, 16  ;;  %v1162_v6 = vshra.s32 %v2479_v0, 16 }
 0x346   : > { %vm1083_vm2 = vcmp.eq.f32.partialorder %v2277_v25, %v1037_v21  ;;  %vm1094_vm3 = vcmp.eq.f32.partialorder %v2289_v18, %v1070_v3 }
 0x347   : > { %v1099_v16 = vsel %vm1083_vm2, %v1996_v12, 8  ;;  %v1110_v23 = vsel %vm1094_vm3, %v1996_v12, 8  ;;  %v2487_v1 = vcvt.s32.f32 %v1267_v60  ;;  %v2489_v24 = vcvt.s32.f32 %v1162_v6 }
 0x348   : > { %v2492_v31 = vsel %vm374_vm1, %v1099_v16, 2147483647  ;;  %v2495_v34 = vsel %vm374_vm1, %v1110_v23, 2147483647 }
 0x349   : > { %1270 = vmin.xlane.f32.xlu0 %v2487_v1  ;;  %v1061_v58 = vpop.xlane.xlu0 %1060  ;;  %1165 = vmin.xlane.f32.xlu1 %v2489_v24  ;;  %v1117_v25 = vshra.s32 %v2492_v31, 16  ;;  %v1282_v18 = vshra.s32 %v2495_v34, 16 }
 0x34a   : > { %vm1091_vm8 = vcmp.eq.f32.partialorder %v2303_v29, %v1061_v58  ;;  %v1040_v38 = vpop.xlane.xlu1 %1039 }
 0x34b   : > { %v1107_v56 = vsel %vm1091_vm8, %v1996_v12, 8  ;;  %vm1084_vm2 = vcmp.eq.f32.partialorder %v2317_v14, %v1040_v38  ;;  %v2504_v41 = vcvt.s32.f32 %v1117_v25  ;;  %v2506_v21 = vcvt.s32.f32 %v1282_v18 }
 0x34c   : > { %v1100_v3 = vsel %vm1084_vm2, %v1996_v12, 8  ;;  %v2510_v60 = vsel %vm374_vm1, %v1107_v56, 2147483647 }
 0x34d   : > { %1120 = vmin.xlane.f32.xlu0 %v2504_v41  ;;  %1285 = vmin.xlane.f32.xlu1 %v2506_v21  ;;  %v1237_v29 = vshra.s32 %v2510_v60, 16  ;;  %v2516_v6 = vsel %vm374_vm1, %v1100_v3, 2147483647 }
 0x34e   : > { %v1055_v16 = vpop.xlane.xlu0 %1054  ;;  %v1064_v14 = vpop.xlane.xlu1 %1063  ;;  %v1132_v23 = vshra.s32 %v2516_v6, 16 }
 0x34f   : > { %vm1089_vm3 = vcmp.eq.f32.partialorder %v2335_v20, %v1055_v16  ;;  %vm1092_vm8 = vcmp.eq.f32.partialorder %v2341_v45, %v1064_v14  ;;  %v2521_v58 = vcvt.s32.f32 %v1237_v29 }
 0x350   : > { %v1105_v25 = vsel %vm1089_vm3, %v1996_v12, 8  ;;  %v1108_v18 = vsel %vm1092_vm8, %v1996_v12, 8  ;;  %v2525_v38 = vcvt.s32.f32 %v1132_v23 }
 0x351   : > { %1240 = vmin.xlane.f32.xlu0 %v2521_v58  ;;  %v2529_v56 = vsel %vm374_vm1, %v1105_v25, 2147483647  ;;  %v2532_v3 = vsel %vm374_vm1, %v1108_v18, 2147483647 }
 0x352   : > { %v1049_v2 = vpop.xlane.xlu0 %1048  ;;  %1135 = vmin.xlane.f32.xlu1 %v2525_v38  ;;  %v1058_v20 = vpop.xlane.xlu1 %1057  ;;  %v1207_v45 = vshra.s32 %v2529_v56, 16  ;;  %v1252_v29 = vshra.s32 %v2532_v3, 16 }
 0x353   : > { %vm1087_vm2 = vcmp.eq.f32.partialorder %v2361_v59, %v1049_v2  ;;  %vm1090_vm3 = vcmp.eq.f32.partialorder %v2367_v9, %v1058_v20 }
 0x354   : > { %v1103_v16 = vsel %vm1087_vm2, %v1996_v12, 8  ;;  %v1106_v14 = vsel %vm1090_vm3, %v1996_v12, 8  ;;  %v2541_v23 = vcvt.s32.f32 %v1207_v45  ;;  %v2543_v25 = vcvt.s32.f32 %v1252_v29 }
 0x355   : > { %v2546_v18 = vsel %vm374_vm1, %v1103_v16, 2147483647  ;;  %v2549_v53 = vsel %vm374_vm1, %v1106_v14, 2147483647 }
 0x356   : > { %1210 = vmin.xlane.f32.xlu0 %v2541_v23  ;;  %v1073_v57 = vpop.xlane.xlu0 %1072  ;;  %1255 = vmin.xlane.f32.xlu1 %v2543_v25  ;;  %v1052_v59 = vpop.xlane.xlu1 %1051  ;;  %v1177_v9 = vshra.s32 %v2546_v18, 16  ;;  %v1222_v2 = vshra.s32 %v2549_v53, 16 }
 0x357   : > { %vm1095_vm8 = vcmp.eq.f32.partialorder %v2386_v43, %v1073_v57  ;;  %vm1088_vm2 = vcmp.eq.f32.partialorder %v2392_v44, %v1052_v59 }
 0x358   : > { %v1111_v20 = vsel %vm1095_vm8, %v1996_v12, 8  ;;  %v1104_v45 = vsel %vm1088_vm2, %v1996_v12, 8  ;;  %v2559_v29 = vcvt.s32.f32 %v1177_v9  ;;  %v2561_v16 = vcvt.s32.f32 %v1222_v2 }
 0x359   : > { %v2564_v14 = vsel %vm374_vm1, %v1111_v20, 2147483647  ;;  %v2567_v35 = vsel %vm374_vm1, %v1104_v45, 2147483647 }
 0x35a   : > { %1180 = vmin.xlane.f32.xlu0 %v2559_v29  ;;  %v1079_v50 = vpop.xlane.xlu0 %1078  ;;  %1225 = vmin.xlane.f32.xlu1 %v2561_v16  ;;  %v1076_v57 = vpop.xlane.xlu1 %1075  ;;  %v1297_v43 = vshra.s32 %v2564_v14, 16  ;;  %v1192_v44 = vshra.s32 %v2567_v35, 16 }
 0x35b   : > { %vm1097_vm3 = vcmp.eq.f32.partialorder %v2404_v63, %v1079_v50  ;;  %vm1096_vm8 = vcmp.eq.f32.partialorder %v2416_v47, %v1076_v57 }
 0x35c   : > { %v1113_v59 = vsel %vm1097_vm3, %v1996_v12, 8  ;;  %v1112_v9 = vsel %vm1096_vm8, %v1996_v12, 8  ;;  %v2577_v2 = vcvt.s32.f32 %v1297_v43  ;;  %v2579_v20 = vcvt.s32.f32 %v1192_v44 }
 0x35d   : > { %v2582_v45 = vsel %vm374_vm1, %v1113_v59, 2147483647  ;;  %v2585_v33 = vsel %vm374_vm1, %v1112_v9, 2147483647 }
 0x35e   : > { %1300 = vmin.xlane.f32.xlu0 %v2577_v2  ;;  %v377_v39 = vpop.xlane.xlu0 %376  ;;  %1195 = vmin.xlane.f32.xlu1 %v2579_v20  ;;  %v1082_v50 = vpop.xlane.xlu1 %1081  ;;  %v1327_v63 = vshra.s32 %v2582_v45, 16  ;;  %v1312_v47 = vshra.s32 %v2585_v33, 16 }
 0x35f   : > { %v423_v57 = vsub.f32 %v1891_v30, %v377_v39  ;;  %vm1098_vm2 = vcmp.eq.f32.partialorder %v2426_v8, %v1082_v50 }
 0x360   : > { %v1114_v43 = vsel %vm1098_vm2, %v1996_v12, 8  ;;  %v2594_v44 = vcvt.s32.f32 %v1327_v63  ;;  %v2596_v59 = vcvt.s32.f32 %v1312_v47 }
 0x361   : > { %v439_v9 = vmul.f32 1.442695, %v423_v57  ;;  %v2599_v52 = vsel %vm374_vm1, %v1114_v43, 2147483647 }
 0x362   : > { %1330 = vmin.xlane.f32.xlu0 %v2594_v44  ;;  %v383_v40 = vpop.xlane.xlu0 %382  ;;  %1315 = vmin.xlane.f32.xlu1 %v2596_v59  ;;  %v380_v5 = vpop.xlane.xlu1 %379  ;;  %v1342_v30 = vshra.s32 %v2599_v52, 16 }
 0x363   : > { %1663 = vpow2.f32 %v439_v9  ;;  %v425_v39 = vsub.f32 %v1884_v27, %v383_v40  ;;  %v424_v8 = vsub.f32 %v1905_v36, %v380_v5 }
 0x364   : > { %v2606_v50 = vcvt.s32.f32 %v1342_v30 }
 0x365   : > { %v443_v63 = vmul.f32 1.442695, %v425_v39  ;;  %v441_v47 = vmul.f32 1.442695, %v424_v8 }
 0x366   : > { %v389_v57 = vpop.xlane.xlu0 %388  ;;  %1345 = vmin.xlane.f32.xlu1 %v2606_v50  ;;  %v386_v43 = vpop.xlane.xlu1 %385 }
 0x367   : > { %1665 = vpow2.f32 %v443_v63  ;;  %v427_v48 = vsub.f32 %v1928_v46, %v389_v57  ;;  %v426_v4 = vsub.f32 %v3329_v22, %v386_v43 }
 0x368   : > { %1667 = vpow2.f32 %v441_v47 }
 0x369   : > { %v447_v54 = vmul.f32 1.442695, %v427_v48  ;;  %v445_v9 = vmul.f32 1.442695, %v426_v4 }
 0x36a   : > { %v395_v42 = vpop.xlane.xlu0 %394  ;;  %v392_v27 = vpop.xlane.xlu1 %391 }
 0x36b   : > { %1669 = vpow2.f32 %v447_v54  ;;  %v429_v36 = vsub.f32 %v3330_v26, %v395_v42  ;;  %v428_v40 = vsub.f32 %v3331_v17, %v392_v27 }
 0x36c   : > { %1671 = vpow2.f32 %v445_v9 }
 0x36d   : > { %v2613_v5 = vpop.eup %1663  ;;  %v451_v30 = vmul.f32 1.442695, %v429_v36  ;;  %v449_v39 = vmul.f32 1.442695, %v428_v40 }
 0x36e   : > { %v401_v8 = vpop.xlane.xlu0 %400  ;;  %v398_v63 = vpop.xlane.xlu1 %397  ;;  %v471_v46 = vsel %vm374_vm1, %v2613_v5, 0.0 }
 0x36f   : > { %1673 = vpow2.f32 %v451_v30  ;;  %v431_v4 = vsub.f32 %v3332_v19, %v401_v8  ;;  %v430_v48 = vsub.f32 %v3333_v10, %v398_v63  ;;  %472 = vadd.xlane.f32.xlu0 %v471_v46 }
 0x370   : > { %1675 = vpow2.f32 %v449_v39 }
 0x371   : > { %v2619_v42 = vpop.eup %1665  ;;  %v455_v54 = vmul.f32 1.442695, %v431_v4  ;;  %v453_v22 = vmul.f32 1.442695, %v430_v48 }
 0x372   : > { %v2621_v26 = vpop.eup %1667  ;;  %v407_v17 = vpop.xlane.xlu0 %406  ;;  %v477_v57 = vsel %vm374_vm1, %v2619_v42, 0.0 }
 0x373   : > { %v404_v47 = vpop.xlane.xlu1 %403  ;;  %1677 = vpow2.f32 %v455_v54  ;;  %v433_v43 = vsub.f32 %v3334_v13, %v407_v17  ;;  %478 = vadd.xlane.f32.xlu0 %v477_v57  ;;  %v474_v10 = vsel %vm374_vm1, %v2621_v26, 0.0 }
 0x374   : > { %v432_v19 = vsub.f32 %v3335_v62, %v404_v47  ;;  %1679 = vpow2.f32 %v453_v22  ;;  %475 = vadd.xlane.f32.xlu1 %v474_v10 }
 0x375   : > { %v2629_v9 = vpop.eup %1669  ;;  %v459_v27 = vmul.f32 1.442695, %v433_v43 }
 0x376   : > { %v457_v36 = vmul.f32 1.442695, %v432_v19  ;;  %v2631_v40 = vpop.eup %1671  ;;  %v413_v30 = vpop.xlane.xlu0 %412  ;;  %v483_v8 = vsel %vm374_vm1, %v2629_v9, 0.0 }
 0x377   : > { %v410_v39 = vpop.xlane.xlu1 %409  ;;  %1681 = vpow2.f32 %v459_v27  ;;  %v435_v13 = vsub.f32 %v3336_v51, %v413_v30  ;;  %484 = vadd.xlane.f32.xlu0 %v483_v8  ;;  %v480_v63 = vsel %vm374_vm1, %v2631_v40, 0.0 }
 0x378   : > { %v434_v62 = vsub.f32 %v3337_v61, %v410_v39  ;;  %1683 = vpow2.f32 %v457_v36  ;;  %481 = vadd.xlane.f32.xlu1 %v480_v63 }
 0x379   : > { %v2639_v46 = vpop.eup %1673  ;;  %v463_v4 = vmul.f32 1.442695, %v435_v13 }
 0x37a   : > { %v461_v48 = vmul.f32 1.442695, %v434_v62  ;;  %v2641_v54 = vpop.eup %1675  ;;  %v419_v22 = vpop.xlane.xlu0 %418  ;;  %v489_v47 = vsel %vm374_vm1, %v2639_v46, 0.0 }
 0x37b   : > { %v416_v17 = vpop.xlane.xlu1 %415  ;;  %1685 = vpow2.f32 %v463_v4  ;;  %v437_v51 = vsub.f32 %v3338_v11, %v419_v22  ;;  %490 = vadd.xlane.f32.xlu0 %v489_v47  ;;  %v486_v57 = vsel %vm374_vm1, %v2641_v54, 0.0 }
 0x37c   : > { %v436_v61 = vsub.f32 %v3339_v15, %v416_v17  ;;  %1687 = vpow2.f32 %v461_v48  ;;  %487 = vadd.xlane.f32.xlu1 %v486_v57 }
 0x37d   : > { %v2649_v43 = vpop.eup %1677  ;;  %v467_v19 = vmul.f32 1.442695, %v437_v51 }
 0x37e   : > { %v465_v10 = vmul.f32 1.442695, %v436_v61  ;;  %v2651_v27 = vpop.eup %1679  ;;  %v495_v30 = vsel %vm374_vm1, %v2649_v43, 0.0 }
 0x37f   : > { %v422_v36 = vpop.xlane.xlu1 %421  ;;  %1689 = vpow2.f32 %v467_v19  ;;  %496 = vadd.xlane.f32.xlu0 %v495_v30  ;;  %v492_v15 = vsel %vm374_vm1, %v2651_v27, 0.0 }
 0x380   : > { %v438_v11 = vsub.f32 %v3340_v49, %v422_v36  ;;  %1691 = vpow2.f32 %v465_v10  ;;  %493 = vadd.xlane.f32.xlu1 %v492_v15  ;;  %v1146_v10 = vand.u32 65535, %v2465_v7  ;;  %v1161_v15 = vand.u32 65535, %v2479_v0 }
 0x381   : > { %v2658_v39 = vpop.eup %1681  ;;  %v1236_v0 = vand.u32 65535, %v2510_v60 }
 0x382   : > { %v469_v8 = vmul.f32 1.442695, %v438_v11  ;;  %v2660_v13 = vpop.eup %1683  ;;  %v501_v62 = vsel %vm374_vm1, %v2658_v39, 0.0  ;;  %v1148_v30 = vcvt.s32.f32 %v1146_v10  ;;  %v1266_v11 = vand.u32 65535, %v2476_v32 }
 0x383   : > { %502 = vadd.xlane.f32.xlu0 %v501_v62  ;;  %v498_v63 = vsel %vm374_vm1, %v2660_v13, 0.0  ;;  %v1116_v62 = vand.u32 65535, %v2492_v31  ;;  %v1131_v10 = vand.u32 65535, %v2516_v6  ;;  %v1238_v60 = vcvt.s32.f32 %v1236_v0 }
 0x384   : > { %1693 = vpow2.f32 %v469_v8  ;;  %499 = vadd.xlane.f32.xlu1 %v498_v63  ;;  %v1281_v63 = vand.u32 65535, %v2495_v34  ;;  %v1268_v7 = vcvt.s32.f32 %v1266_v11  ;;  %v1206_v11 = vand.u32 65535, %v2529_v56 }
 0x385   : > { %v2666_v49 = vpop.eup %1685 }
 0x386   : > { %v2668_v4 = vpop.eup %1687  ;;  %v507_v48 = vsel %vm374_vm1, %v2666_v49, 0.0 }
 0x387   : > { %508 = vadd.xlane.f32.xlu0 %v507_v48  ;;  %v504_v22 = vsel %vm374_vm1, %v2668_v4, 0.0 }
 0x388   : > { %505 = vadd.xlane.f32.xlu1 %v504_v22 }
 0x389   : > { %v2674_v17 = vpop.eup %1689 }
 0x38a   : > { %v2676_v47 = vpop.eup %1691  ;;  %v513_v51 = vsel %vm374_vm1, %v2674_v17, 0.0 }
 0x38b   : > { %514 = vadd.xlane.f32.xlu0 %v513_v51  ;;  %v510_v61 = vsel %vm374_vm1, %v2676_v47, 0.0  ;;  %v1163_v51 = vcvt.s32.f32 %v1161_v15  ;;  %v1251_v15 = vand.u32 65535, %v2532_v3 }
 0x38c   : > { %511 = vadd.xlane.f32.xlu1 %v510_v61  ;;  %v1118_v61 = vcvt.s32.f32 %v1116_v62  ;;  %v1176_v62 = vand.u32 65535, %v2546_v18  ;;  %v1296_v18 = vand.u32 65535, %v2564_v14  ;;  %v1326_v14 = vand.u32 65535, %v2582_v45 }
 0x38d   : > { %v1341_v45 = vand.u32 65535, %v2599_v52 }
 0x38e   : > { %v2682_v57 = vpop.eup %1693  ;;  %v1178_v0 = vcvt.s32.f32 %v1176_v62 }
 0x38f   : > { %v516_v19 = vsel %vm374_vm1, %v2682_v57, 0.0 }
 0x390   : > { %517 = vadd.xlane.f32.xlu1 %v516_v19  ;;  %v1283_v19 = vcvt.s32.f32 %v1281_v63  ;;  %v1221_v63 = vand.u32 65535, %v2549_v53  ;;  %v1191_v53 = vand.u32 65535, %v2567_v35  ;;  %v1311_v35 = vand.u32 65535, %v2585_v33 }
 0x3d2   : > { %v2687_v36 = vpop.xlane.xlu0 %1150 }
 0x3d3   : > { %vm1152_vm3 = vcmp.eq.f32.partialorder %v2470_v55, %v2687_v36 }
 0x3d4   : > { %v1153_v8 = vsel %vm1152_vm3, %v1148_v30, inf }
 0x3d5   : > { %1154 = vmin.xlane.f32.xlu0 %v1153_v8 }
 0x3d6   : > { %v2695_v48 = vpop.xlane.xlu0 %1270  ;;  %v2697_v22 = vpop.xlane.xlu1 %1165 }
 0x3d7   : > { %vm1272_vm8 = vcmp.eq.f32.partialorder %v2487_v1, %v2695_v48  ;;  %vm1167_vm2 = vcmp.eq.f32.partialorder %v2489_v24, %v2697_v22 }
 0x3d8   : > { %v1273_v32 = vsel %vm1272_vm8, %v1268_v7, inf  ;;  %v1168_v55 = vsel %vm1167_vm2, %v1163_v51, inf  ;;  %v1208_v7 = vcvt.s32.f32 %v1206_v11  ;;  %v1328_v11 = vcvt.s32.f32 %v1326_v14 }
 0x3d9   : > { %1274 = vmin.xlane.f32.xlu0 %v1273_v32  ;;  %1169 = vmin.xlane.f32.xlu1 %v1168_v55 }
 0x3da   : > { %v2704_v31 = vpop.xlane.xlu0 %1120  ;;  %v2706_v34 = vpop.xlane.xlu1 %1285 }
 0x3db   : > { %vm1122_vm3 = vcmp.eq.f32.partialorder %v2504_v41, %v2704_v31  ;;  %vm1287_vm15 = vcmp.eq.f32.partialorder %v2506_v21, %v2706_v34  ;;  %v1133_v41 = vcvt.s32.f32 %v1131_v10 }
 0x3dc   : > { %v1123_v1 = vsel %vm1122_vm3, %v1118_v61, inf  ;;  %v1288_v24 = vsel %vm1287_vm15, %v1283_v19, inf  ;;  %v1223_v61 = vcvt.s32.f32 %v1221_v63 }
 0x3dd   : > { %1124 = vmin.xlane.f32.xlu0 %v1123_v1  ;;  %1289 = vmin.xlane.f32.xlu1 %v1288_v24  ;;  %v1298_v1 = vcvt.s32.f32 %v1296_v18  ;;  %v1193_v24 = vcvt.s32.f32 %v1191_v53 }
 0x3de   : > { %v2713_v30 = vpop.xlane.xlu0 %1240 }
 0x3df   : > { %vm1242_vm8 = vcmp.eq.f32.partialorder %v2521_v58, %v2713_v30  ;;  %v2719_v6 = vpop.xlane.xlu1 %1135  ;;  %v1253_v58 = vcvt.s32.f32 %v1251_v15  ;;  %v1313_v15 = vcvt.s32.f32 %v1311_v35 }
 0x3e0   : > { %vm1137_vm2 = vcmp.eq.f32.partialorder %v2525_v38, %v2719_v6  ;;  %v1243_v21 = vsel %vm1242_vm8, %v1238_v60, inf }
 0x3e1   : > { %1244 = vmin.xlane.f32.xlu0 %v1243_v21  ;;  %v1138_v8 = vsel %vm1137_vm2, %v1133_v41, inf  ;;  %v1343_v21 = vcvt.s32.f32 %v1341_v45 }
 0x3e2   : > { %1139 = vmin.xlane.f32.xlu1 %v1138_v8 }
 0x3e3   : > { %v2725_v56 = vpop.xlane.xlu0 %1210  ;;  %v2727_v3 = vpop.xlane.xlu1 %1255 }
 0x3e4   : > { %vm1212_vm15 = vcmp.eq.f32.partialorder %v2541_v23, %v2725_v56  ;;  %vm1257_vm3 = vcmp.eq.f32.partialorder %v2543_v25, %v2727_v3 }
 0x3e5   : > { %v1213_v38 = vsel %vm1212_vm15, %v1208_v7, inf  ;;  %v1258_v51 = vsel %vm1257_vm3, %v1253_v58, inf }
 0x3e6   : > { %1214 = vmin.xlane.f32.xlu0 %v1213_v38  ;;  %1259 = vmin.xlane.f32.xlu1 %v1258_v51 }
 0x3e7   : > { %v2735_v32 = vpop.xlane.xlu0 %1180  ;;  %v2737_v55 = vpop.xlane.xlu1 %1225 }
 0x3e8   : > { %vm1182_vm8 = vcmp.eq.f32.partialorder %v2559_v29, %v2735_v32  ;;  %vm1227_vm2 = vcmp.eq.f32.partialorder %v2561_v16, %v2737_v55 }
 0x3e9   : > { %v1183_v23 = vsel %vm1182_vm8, %v1178_v0, inf  ;;  %v1228_v25 = vsel %vm1227_vm2, %v1223_v61, inf }
 0x3ea   : > { %1184 = vmin.xlane.f32.xlu0 %v1183_v23  ;;  %1229 = vmin.xlane.f32.xlu1 %v1228_v25 }
 0x3eb   : > { %v2745_v19 = vpop.xlane.xlu0 %1300  ;;  %v2747_v10 = vpop.xlane.xlu1 %1195 }
 0x3ec   : > { %vm1302_vm15 = vcmp.eq.f32.partialorder %v2577_v2, %v2745_v19  ;;  %vm1197_vm3 = vcmp.eq.f32.partialorder %v2579_v20, %v2747_v10 }
 0x3ed   : > { %v1303_v29 = vsel %vm1302_vm15, %v1298_v1, inf  ;;  %v1198_v16 = vsel %vm1197_vm3, %v1193_v24, inf }
 0x3ee   : > { %1304 = vmin.xlane.f32.xlu0 %v1303_v29  ;;  %1199 = vmin.xlane.f32.xlu1 %v1198_v16 }
 0x3ef   : > { %v2754_v60 = vpop.xlane.xlu0 %1330  ;;  %v2756_v33 = vpop.xlane.xlu1 %1315 }
 0x3f0   : > { %vm1332_vm8 = vcmp.eq.f32.partialorder %v2594_v44, %v2754_v60  ;;  %vm1317_vm2 = vcmp.eq.f32.partialorder %v2596_v59, %v2756_v33 }
 0x3f1   : > { %v1333_v2 = vsel %vm1332_vm8, %v1328_v11, inf  ;;  %v1318_v20 = vsel %vm1317_vm2, %v1313_v15, inf }
 0x3f2   : > { %1334 = vmin.xlane.f32.xlu0 %v1333_v2  ;;  %1319 = vmin.xlane.f32.xlu1 %v1318_v20 }
 0x3f3   : > { %v2762_v41 = vpop.xlane.xlu1 %1345 }
 0x3f4   : > { %vm1347_vm15 = vcmp.eq.f32.partialorder %v2606_v50, %v2762_v41 }
 0x3f5   : > { %v1348_v52 = vsel %vm1347_vm15, %v1343_v21, inf }
 0x3f6   : > { %1349 = vmin.xlane.f32.xlu1 %v1348_v52 }
 0x3fc   : > { %v473_v8 = vpop.xlane.xlu0 %472 }
 0x3fd   : > { %1695 = vrcp.f32 %v473_v8 }
 0x400   : > { %v479_v62 = vpop.xlane.xlu0 %478 }
 0x401   : > { %1697 = vrcp.f32 %v479_v62  ;;  %v476_v44 = vpop.xlane.xlu1 %475 }
 0x402   : > { %1699 = vrcp.f32 %v476_v44 }
 0x404   : > { %v485_v63 = vpop.xlane.xlu0 %484 }
 0x405   : > { %1701 = vrcp.f32 %v485_v63  ;;  %v482_v59 = vpop.xlane.xlu1 %481 }
 0x406   : > { %1703 = vrcp.f32 %v482_v59 }
 0x407   : > { %v1696_v7 = vpop.eup %1695 }
 0x408   : > { %v535_v58 = vmul.f32 2.0, %v1696_v7  ;;  %v491_v38 = vpop.xlane.xlu0 %490  ;;  %v3342_v7 = vld [vmem:[#allocation24_spill] sm:$0xff] }
 0x409   : > { %1705 = vrcp.f32 %v491_v38  ;;  %v488_v51 = vpop.xlane.xlu1 %487 }
 0x40a   : > { %1707 = vrcp.f32 %v488_v51  ;;  %v2767_v50 = vmul.f32 %v2613_v5, %v535_v58 }
 0x40b   : > { %v1698_v18 = vpop.eup %1697 }
 0x40c   : > { %v1700_v53 = vpop.eup %1699  ;;  %v537_v0 = vmul.f32 2.0, %v1698_v18  ;;  %v497_v61 = vpop.xlane.xlu0 %496  ;;  %v905_v23 = vsel %vm889_vm7, %v2767_v50, 0.0 }
 0x40d   : > { %v536_v25 = vmul.f32 2.0, %v1700_v53  ;;  %1709 = vrcp.f32 %v497_v61  ;;  %v494_v14 = vpop.xlane.xlu1 %493  ;;  %v921_v35 = vsel %vm374_vm1, %v905_v23, 0.0 }
 0x40e   : > { %1711 = vrcp.f32 %v494_v14  ;;  %922 = vadd.xlane.f32.xlu0 %v921_v35  ;;  %v2775_v1 = vmul.f32 %v2619_v42, %v537_v0  ;;  %v3341_v42 = vld [vmem:[#allocation21_spill] sm:$0xff] }
 0x40f   : > { %v1702_v5 = vpop.eup %1701  ;;  %v2778_v24 = vmul.f32 %v2621_v26, %v536_v25 }
 0x410   : > { %v1704_v29 = vpop.eup %1703  ;;  %v539_v16 = vmul.f32 2.0, %v1702_v5  ;;  %v503_v45 = vpop.xlane.xlu0 %502  ;;  %v907_v11 = vsel %vm891_vm4, %v2775_v1, 0.0  ;;  %v3344_v5 = vld [vmem:[#allocation22_spill] sm:$0xff] }
 0x411   : > { %v538_v15 = vmul.f32 2.0, %v1704_v29  ;;  %1713 = vrcp.f32 %v503_v45  ;;  %v500_v2 = vpop.xlane.xlu1 %499  ;;  %v927_v20 = vsel %vm374_vm1, %v907_v11, 0.0  ;;  %v906_v21 = vsel %vm890_vm10, %v2778_v24, 0.0  ;;  %v3345_v11 = vld [vmem:[#allocation27_spill] sm:$0xff] }
 0x412   : > { %1715 = vrcp.f32 %v500_v2  ;;  %928 = vadd.xlane.f32.xlu0 %v927_v20  ;;  %v924_v26 = vsel %vm374_vm1, %v906_v21, 0.0  ;;  %v2791_v52 = vmul.f32 %v2629_v9, %v539_v16  ;;  %v3343_v9 = vld [vmem:[#allocation18_spill] sm:$0xff] }
 0x413   : > { %v1706_v8 = vpop.eup %1705  ;;  %925 = vadd.xlane.f32.xlu1 %v924_v26  ;;  %v2794_v62 = vmul.f32 %v2631_v40, %v538_v15 }
 0x414   : > { %v1708_v44 = vpop.eup %1707  ;;  %v541_v63 = vmul.f32 2.0, %v1706_v8  ;;  %v509_v59 = vpop.xlane.xlu0 %508  ;;  %v909_v58 = vsel %vm893_vm13, %v2791_v52, 0.0 }
 0x415   : > { %v540_v38 = vmul.f32 2.0, %v1708_v44  ;;  %1717 = vrcp.f32 %v509_v59  ;;  %v506_v51 = vpop.xlane.xlu1 %505  ;;  %v933_v18 = vsel %vm374_vm1, %v909_v58, 0.0  ;;  %v908_v53 = vsel %vm892_vm6, %v2794_v62, 0.0  ;;  %v3346_v44 = vld [vmem:[#allocation20_spill] sm:$0xff] }
 0x416   : > { %1719 = vrcp.f32 %v506_v51  ;;  %934 = vadd.xlane.f32.xlu0 %v933_v18  ;;  %v930_v40 = vsel %vm374_vm1, %v908_v53, 0.0  ;;  %v2807_v0 = vmul.f32 %v2639_v46, %v541_v63 }
 0x417   : > { %v1710_v61 = vpop.eup %1709  ;;  %931 = vadd.xlane.f32.xlu1 %v930_v40  ;;  %v2810_v23 = vmul.f32 %v2641_v54, %v540_v38  ;;  %v3347_v38 = vld [vmem:[#allocation25_spill] sm:$0xff] }
 0x418   : > { %v1712_v25 = vpop.eup %1711  ;;  %v543_v14 = vmul.f32 2.0, %v1710_v61  ;;  %v515_v35 = vpop.xlane.xlu0 %514  ;;  %v911_v29 = vsel %vm895_vm11, %v2807_v0, 0.0 }
 0x419   : > { %v542_v16 = vmul.f32 2.0, %v1712_v25  ;;  %1721 = vrcp.f32 %v515_v35  ;;  %v512_v45 = vpop.xlane.xlu1 %511  ;;  %v939_v46 = vsel %vm374_vm1, %v911_v29, 0.0  ;;  %v910_v54 = vsel %vm894_vm0, %v2810_v23, 0.0  ;;  %v3348_v35 = vld [vmem:[#allocation17_spill] sm:$0xff] }
 0x41a   : > { %1723 = vrcp.f32 %v512_v45  ;;  %940 = vadd.xlane.f32.xlu0 %v939_v46  ;;  %v936_v15 = vsel %vm374_vm1, %v910_v54, 0.0  ;;  %v2823_v2 = vmul.f32 %v2649_v43, %v543_v14  ;;  %v3349_v46 = vld [vmem:[#allocation23_spill] sm:$0xff] }
 0x41b   : > { %v1714_v20 = vpop.eup %1713  ;;  %937 = vadd.xlane.f32.xlu1 %v936_v15  ;;  %v2827_v21 = vmul.f32 %v2651_v27, %v542_v16  ;;  %v1791_v27 = vmov 0.0  }
 0x41c   : > { %v1716_v26 = vpop.eup %1715  ;;  %v545_v8 = vmul.f32 2.0, %v1714_v20  ;;  %v913_v63 = vsel %vm897_vm9, %v2823_v2, 0.0  ;;  %173 = vst [vmem:[%s2840_s10] sm:$0xff] %v1791_v27  ;;  %174 = vst [vmem:[%s2840_s10 + $0x8] sm:$0xff] %v1791_v27 }
 0x41d   : > { %v544_v59 = vmul.f32 2.0, %v1716_v26  ;;  %v518_v58 = vpop.xlane.xlu1 %517  ;;  %v945_v43 = vsel %vm374_vm1, %v913_v63, 0.0  ;;  %v912_v51 = vsel %vm896_vm14, %v2827_v21, 0.0  ;;  %175 = vst [vmem:[%s2840_s10 + $0x10] sm:$0xff] %v1791_v27  ;;  %176 = vst [vmem:[%s2840_s10 + $0x18] sm:$0xff] %v1791_v27  ;;  %v3350_v63 = vld [vmem:[#allocation26_spill] sm:$0xff] }
 0x41e   : > { %177 = vst [vmem:[%s2840_s10 + $0x20] sm:$0xff] %v1791_v27  ;;  %178 = vst [vmem:[%s2840_s10 + $0x28] sm:$0xff] %v1791_v27  ;;  %1725 = vrcp.f32 %v518_v58  ;;  %946 = vadd.xlane.f32.xlu0 %v945_v43  ;;  %v942_v18 = vsel %vm374_vm1, %v912_v51, 0.0  ;;  %v2860_v53 = vmul.f32 %v2658_v39, %v545_v8  ;;  %vm3351_vm4 = vcmp.eq.s32.totalorder %v1996_v12, %v3350_v63  ;;  %v3352_v51 = vld [vmem:[#allocation19_spill] sm:$0xff] }
 0x41f   : > { %179 = vst [vmem:[%s2840_s10 + $0x30] sm:$0xff] %v1791_v27  ;;  %180 = vst [vmem:[%s2840_s10 + $0x38] sm:$0xff] %v1791_v27  ;;  %v1718_v40 = vpop.eup %1717  ;;  %943 = vadd.xlane.f32.xlu1 %v942_v18  ;;  %v2863_v61 = vmul.f32 %v2660_v13, %v544_v59 }
 0x420   : > { %181 = vst [vmem:[%s2840_s10 + $0x40] sm:$0xff] %v1791_v27  ;;  %182 = vst [vmem:[%s2840_s10 + $0x48] sm:$0xff] %v1791_v27  ;;  %v1720_v25 = vpop.eup %1719  ;;  %v547_v14 = vmul.f32 2.0, %v1718_v40  ;;  %v915_v29 = vsel %vm899_vm5, %v2860_v53, 0.0  ;;  %vm3353_vm5 = vcmp.eq.s32.totalorder %v1996_v12, %v3352_v51 }
 0x421   : > { %183 = vst [vmem:[%s2840_s10 + $0x50] sm:$0xff] %v1791_v27  ;;  %184 = vst [vmem:[%s2840_s10 + $0x58] sm:$0xff] %v1791_v27  ;;  %v546_v16 = vmul.f32 2.0, %v1720_v25  ;;  %v951_v45 = vsel %vm374_vm1, %v915_v29, 0.0  ;;  %v914_v39 = vsel %vm898_vm12, %v2863_v61, 0.0  ;;  %v3354_v25 = vld [vmem:[#allocation28_spill] sm:$0xff] }
 0x422   : > { %185 = vst [vmem:[%s2840_s10 + $0x60] sm:$0xff] %v1791_v27  ;;  %186 = vst [vmem:[%s2840_s10 + $0x68] sm:$0xff] %v1791_v27  ;;  %952 = vadd.xlane.f32.xlu0 %v951_v45  ;;  %v948_v54 = vsel %vm374_vm1, %v914_v39, 0.0  ;;  %v2876_v13 = vmul.f32 %v2666_v49, %v547_v14  ;;  %vm3355_vm6 = vcmp.eq.s32.totalorder %v1996_v12, %v3354_v25  ;;  %v3356_v45 = vld [vmem:[#allocation29_spill] sm:$0xff] }
 0x423   : > { %187 = vst [vmem:[%s2840_s10 + $0x70] sm:$0xff] %v1791_v27  ;;  %188 = vst [vmem:[%s2840_s10 + $0x78] sm:$0xff] %v1791_v27  ;;  %v1722_v15 = vpop.eup %1721  ;;  %949 = vadd.xlane.f32.xlu1 %v948_v54  ;;  %v2879_v20 = vmul.f32 %v2668_v4, %v546_v16  ;;  %vm3357_vm7 = vcmp.eq.s32.totalorder %v1996_v12, %v3356_v45  ;;  %v3358_v54 = vld [vmem:[#allocation30_spill] sm:$0xff] }
 0x424   : > { %v1724_v26 = vpop.eup %1723  ;;  %v549_v8 = vmul.f32 2.0, %v1722_v15  ;;  %v917_v59 = vsel %vm3351_vm4, %v2876_v13, 0.0  ;;  %vm3359_vm9 = vcmp.eq.s32.totalorder %v1996_v12, %v3358_v54 }
 0x425   : > { %v548_v58 = vmul.f32 2.0, %v1724_v26  ;;  %v957_v43 = vsel %vm374_vm1, %v917_v59, 0.0  ;;  %v916_v49 = vsel %vm3353_vm5, %v2879_v20, 0.0 }
 0x426   : > { %958 = vadd.xlane.f32.xlu0 %v957_v43  ;;  %v954_v27 = vsel %vm374_vm1, %v916_v49, 0.0  ;;  %v2892_v4 = vmul.f32 %v2674_v17, %v549_v8  ;;  %v1157_v8 = vcvt.f32.s32 %v2687_v36  ;;  %v1277_v43 = vcvt.f32.s32 %v2695_v48 }
 0x427   : > { %955 = vadd.xlane.f32.xlu1 %v954_v27  ;;  %v2895_v18 = vmul.f32 %v2676_v47, %v548_v58  ;;  %v1172_v49 = vcvt.f32.s32 %v2697_v22  ;;  %v1292_v36 = vcvt.f32.s32 %v2706_v34  ;;  %v1142_v34 = vcvt.f32.s32 %v2719_v6 }
 0x428   : > { %v1726_v40 = vpop.eup %1725  ;;  %v919_v14 = vsel %vm3355_vm6, %v2892_v4, 0.0  ;;  %v1158_v58 = vshll.u32 %v1157_v8, 16 }
 0x429   : > { %v550_v29 = vmul.f32 2.0, %v1726_v40  ;;  %v963_v16 = vsel %vm374_vm1, %v919_v14, 0.0  ;;  %v918_v39 = vsel %vm3357_vm7, %v2895_v18, 0.0  ;;  %v1173_v14 = vshll.u32 %v1172_v49, 16 }
 0x42a   : > { %964 = vadd.xlane.f32.xlu0 %v963_v16  ;;  %v960_v17 = vsel %vm374_vm1, %v918_v39, 0.0  ;;  %v1293_v49 = vshll.u32 %v1292_v36, 16  ;;  %v1217_v36 = vcvt.f32.s32 %v2725_v56 }
 0x42b   : > { %961 = vadd.xlane.f32.xlu1 %v960_v17  ;;  %v2908_v47 = vmul.f32 %v2682_v57, %v550_v29  ;;  %v1278_v57 = vshll.u32 %v1277_v43, 16  ;;  %v1127_v29 = vcvt.f32.s32 %v2704_v31  ;;  %v1247_v31 = vcvt.f32.s32 %v2713_v30 }
 0x42d   : > { %v920_v15 = vsel %vm3359_vm9, %v2908_v47, 0.0  ;;  %v1128_v43 = vshll.u32 %v1127_v29, 16  ;;  %v1248_v29 = vshll.u32 %v1247_v31, 16 }
 0x42e   : > { %v966_v26 = vsel %vm374_vm1, %v920_v15, 0.0 }
 0x42f   : > { %967 = vadd.xlane.f32.xlu1 %v966_v26 }
 0x462   : > { %v1155_v59 = vpop.xlane.xlu0 %1154 }
 0x463   : > { %v1156_v27 = vcvt.f32.s32 %v1155_v59 }
 0x465   : > { %v2918_v40 = vadd.s32 %v1158_v58, %v1156_v27 }
 0x466   : > { %v1275_v16 = vpop.xlane.xlu0 %1274  ;;  %v1170_v39 = vpop.xlane.xlu1 %1169 }
 0x467   : > { %3360 = vst [vmem:[#allocation7_spill] sm:$0xff] %v2918_v40  ;;  %vm1357_vm10 = vcmp.eq.s32.totalorder %v1996_v12, %v2918_v40  ;;  %v1276_v17 = vcvt.f32.s32 %v1275_v16  ;;  %v1171_v15 = vcvt.f32.s32 %v1170_v39 }
 0x468   : > { %v1373_v48 = vsel %vm1357_vm10, %v2775_v1, 0.0 }
 0x469   : > { %v1393_v22 = vsel %vm374_vm1, %v1373_v48, 0.0  ;;  %v2926_v26 = vadd.s32 %v1278_v57, %v1276_v17  ;;  %v2928_v8 = vadd.s32 %v1173_v14, %v1171_v15  ;;  %v1262_v17 = vcvt.f32.s32 %v2727_v3 }
 0x46a   : > { %1394 = vadd.xlane.f32.xlu0 %v1393_v22  ;;  %v1125_v59 = vpop.xlane.xlu0 %1124  ;;  %v1290_v58 = vpop.xlane.xlu1 %1289 }
 0x46b   : > { %v1126_v27 = vcvt.f32.s32 %v1125_v59  ;;  %v1291_v40 = vcvt.f32.s32 %v1290_v58  ;;  %vm1365_vm11 = vcmp.eq.s32.totalorder %v1996_v12, %v2926_v26  ;;  %vm1358_vm12 = vcmp.eq.s32.totalorder %v1996_v12, %v2928_v8 }
 0x46c   : > { %v1381_v30 = vsel %vm1365_vm11, %v2860_v53, 0.0  ;;  %v1374_v14 = vsel %vm1358_vm12, %v2794_v62, 0.0  ;;  %v1143_v53 = vshll.u32 %v1142_v34, 16  ;;  %v1218_v58 = vshll.u32 %v1217_v36, 16 }
 0x46d   : > { %v2936_v1 = vadd.s32 %v1128_v43, %v1126_v27  ;;  %v2938_v57 = vadd.s32 %v1293_v49, %v1291_v40  ;;  %v1417_v16 = vsel %vm374_vm1, %v1381_v30, 0.0  ;;  %v1396_v6 = vsel %vm374_vm1, %v1374_v14, 0.0 }
 0x46e   : > { %v1245_v39 = vpop.xlane.xlu0 %1244  ;;  %1418 = vadd.xlane.f32.xlu0 %v1417_v16  ;;  %1397 = vadd.xlane.f32.xlu1 %v1396_v6  ;;  %v1263_v43 = vshll.u32 %v1262_v17, 16  ;;  %v1187_v49 = vcvt.f32.s32 %v2735_v32  ;;  %v1232_v34 = vcvt.f32.s32 %v2737_v55  ;;  %v1307_v36 = vcvt.f32.s32 %v2745_v19 }
 0x46f   : > { %v1246_v15 = vcvt.f32.s32 %v1245_v39  ;;  %v1140_v48 = vpop.xlane.xlu1 %1139  ;;  %vm1355_vm13 = vcmp.eq.s32.totalorder %v1996_v12, %v2936_v1  ;;  %vm1366_vm14 = vcmp.eq.s32.totalorder %v1996_v12, %v2938_v57  ;;  %vm969_vm11 = vcmask 7168  }
 0x470   : > { %v1141_v40 = vcvt.f32.s32 %v1140_v48  ;;  %v1371_v62 = vsel %vm1355_vm13, %v2767_v50, 0.0  ;;  %v1382_v3 = vsel %vm1366_vm14, %v2879_v20, 0.0  ;;  %v1188_v6 = vshll.u32 %v1187_v49, 16 }
 0x471   : > { %v2951_v22 = vadd.s32 %v1248_v29, %v1246_v15  ;;  %v1387_v56 = vsel %vm374_vm1, %v1371_v62, 0.0  ;;  %v1420_v59 = vsel %vm374_vm1, %v1382_v3, 0.0  ;;  %v1202_v48 = vcvt.f32.s32 %v2747_v10 }
 0x472   : > { %v2955_v31 = vadd.s32 %v1143_v53, %v1141_v40  ;;  %1388 = vadd.xlane.f32.xlu0 %v1387_v56  ;;  %1421 = vadd.xlane.f32.xlu1 %v1420_v59  ;;  %v1308_v3 = vshll.u32 %v1307_v36, 16  ;;  %v1337_v10 = vcvt.f32.s32 %v2754_v60  ;;  %vm1002_vm12 = vcmask 531968  }
 0x473   : > { %v1215_v27 = vpop.xlane.xlu0 %1214  ;;  %v1260_v50 = vpop.xlane.xlu1 %1259  ;;  %vm1363_vm0 = vcmp.eq.s32.totalorder %v1996_v12, %v2951_v22  ;;  %vm1468_vm13 = vcmask 540168  }
 0x474   : > { %v1216_v30 = vcvt.f32.s32 %v1215_v27  ;;  %v1261_v14 = vcvt.f32.s32 %v1260_v50  ;;  %v1379_v20 = vsel %vm1363_vm0, %v2823_v2, 0.0  ;;  %vm1356_vm3 = vcmp.eq.s32.totalorder %v1996_v12, %v2955_v31 }
 0x475   : > { %v1411_v29 = vsel %vm374_vm1, %v1379_v20, 0.0  ;;  %v1372_v39 = vsel %vm1356_vm3, %v2778_v24, 0.0  ;;  %v1233_v2 = vshll.u32 %v1232_v34, 16  ;;  %v1203_v27 = vshll.u32 %v1202_v48, 16 }
 0x476   : > { %v2966_v16 = vadd.s32 %v1218_v58, %v1216_v30  ;;  %v2968_v32 = vadd.s32 %v1263_v43, %v1261_v14  ;;  %1412 = vadd.xlane.f32.xlu0 %v1411_v29  ;;  %v1390_v17 = vsel %vm374_vm1, %v1372_v39, 0.0  ;;  %v1322_v50 = vcvt.f32.s32 %v2756_v33 }
 0x477   : > { %v1185_v55 = vpop.xlane.xlu0 %1184  ;;  %v1230_v15 = vpop.xlane.xlu1 %1229  ;;  %1391 = vadd.xlane.f32.xlu1 %v1390_v17  ;;  %v1338_v20 = vshll.u32 %v1337_v10, 16 }
 0x478   : > { %v1186_v53 = vcvt.f32.s32 %v1185_v55  ;;  %v1231_v40 = vcvt.f32.s32 %v1230_v15  ;;  %vm1361_vm8 = vcmp.eq.s32.totalorder %v1996_v12, %v2966_v16  ;;  %vm1364_vm2 = vcmp.eq.s32.totalorder %v1996_v12, %v2968_v32 }
 0x479   : > { %v1377_v62 = vsel %vm1361_vm8, %v2807_v0, 0.0  ;;  %v1380_v56 = vsel %vm1364_vm2, %v2863_v61, 0.0  ;;  %v1323_v36 = vshll.u32 %v1322_v50, 16  ;;  %v1352_v55 = vcvt.f32.s32 %v2762_v41 }
 0x47a   : > { %v2978_v24 = vadd.s32 %v1188_v6, %v1186_v53  ;;  %v2980_v19 = vadd.s32 %v1233_v2, %v1231_v40  ;;  %v1405_v59 = vsel %vm374_vm1, %v1377_v62, 0.0  ;;  %v1414_v43 = vsel %vm374_vm1, %v1380_v56, 0.0 }
 0x47b   : > { %v1305_v58 = vpop.xlane.xlu0 %1304  ;;  %v1200_v49 = vpop.xlane.xlu1 %1199  ;;  %1406 = vadd.xlane.f32.xlu0 %v1405_v59  ;;  %1415 = vadd.xlane.f32.xlu1 %v1414_v43  ;;  %v1353_v62 = vshll.u32 %v1352_v55, 16  ;;  %v1001_v55 = vcvt.s32.f32 %v3358_v54  ;;  %v1462_v54 = vcvt.s32.f32 %v2926_v26  ;;  %v1463_v26 = vcvt.s32.f32 %v2938_v57 }
 0x47c   : > { %v1306_v34 = vcvt.f32.s32 %v1305_v58  ;;  %v1201_v30 = vcvt.f32.s32 %v1200_v49  ;;  %vm1359_vm15 = vcmp.eq.s32.totalorder %v1996_v12, %v2978_v24  ;;  %vm1362_vm4 = vcmp.eq.s32.totalorder %v1996_v12, %v2980_v19 }
 0x47d   : > { %v1375_v61 = vsel %vm1359_vm15, %v2791_v52, 0.0  ;;  %v1378_v14 = vsel %vm1362_vm4, %v2827_v21, 0.0  ;;  %v987_v49 = vcvt.s32.f32 %v3341_v42 }
 0x47e   : > { %v2992_v60 = vadd.s32 %v1308_v3, %v1306_v34  ;;  %v2994_v0 = vadd.s32 %v1203_v27, %v1201_v30  ;;  %v1399_v33 = vsel %vm374_vm1, %v1375_v61, 0.0  ;;  %v1408_v39 = vsel %vm374_vm1, %v1378_v14, 0.0 }
 0x47f   : > { %v1335_v29 = vpop.xlane.xlu0 %1334  ;;  %v1320_v6 = vpop.xlane.xlu1 %1319  ;;  %1400 = vadd.xlane.f32.xlu0 %v1399_v33  ;;  %1409 = vadd.xlane.f32.xlu1 %v1408_v39  ;;  %v992_v34 = vcvt.s32.f32 %v3344_v5  ;;  %v994_v61 = vcvt.s32.f32 %v3346_v44  ;;  %v993_v5 = vcvt.s32.f32 %v3347_v38  ;;  %v995_v44 = vcvt.s32.f32 %v3349_v46 }
 0x480   : > { %v1336_v17 = vcvt.f32.s32 %v1335_v29  ;;  %v1321_v15 = vcvt.f32.s32 %v1320_v6  ;;  %vm1367_vm5 = vcmp.eq.s32.totalorder %v1996_v12, %v2992_v60  ;;  %vm1360_vm6 = vcmp.eq.s32.totalorder %v1996_v12, %v2994_v0 }
 0x481   : > { %v1383_v2 = vsel %vm1367_vm5, %v2876_v13, 0.0  ;;  %v1376_v48 = vsel %vm1360_vm6, %v2810_v23, 0.0  ;;  %v998_v29 = vcvt.s32.f32 %v3350_v63  ;;  %v1000_v6 = vcvt.s32.f32 %v3354_v25 }
 0x482   : > { %v3005_v52 = vadd.s32 %v1338_v20, %v1336_v17  ;;  %v3007_v21 = vadd.s32 %v1323_v36, %v1321_v15  ;;  %v1423_v41 = vsel %vm374_vm1, %v1383_v2, 0.0  ;;  %v1402_v53 = vsel %vm374_vm1, %v1376_v48, 0.0 }
 0x483   : > { %v1350_v40 = vpop.xlane.xlu1 %1349  ;;  %1424 = vadd.xlane.f32.xlu0 %v1423_v41  ;;  %1403 = vadd.xlane.f32.xlu1 %v1402_v53  ;;  %v996_v20 = vcvt.s32.f32 %v3348_v35  ;;  %v997_v35 = vcvt.s32.f32 %v3352_v51  ;;  %v999_v63 = vcvt.s32.f32 %v3356_v45  ;;  %v3361_v45 = vld [vmem:[#allocation7_spill] sm:$0xff]  ;;  %v1455_v2 = vcvt.s32.f32 %v2928_v8 }
 0x484   : > { %v1351_v56 = vcvt.f32.s32 %v1350_v40  ;;  %vm1369_vm7 = vcmp.eq.s32.totalorder %v1996_v12, %v3005_v52  ;;  %vm1368_vm9 = vcmp.eq.s32.totalorder %v1996_v12, %v3007_v21  ;;  %v1454_v17 = vcvt.s32.f32 %v3361_v45 }
 0x485   : > { %v1385_v3 = vsel %vm1369_vm7, %v2892_v4, 0.0  ;;  %v1384_v10 = vsel %vm1368_vm9, %v2895_v18, 0.0  ;;  %v986_v18 = vcvt.s32.f32 %v2249_v28  ;;  %v990_v28 = vcvt.s32.f32 %v3342_v7 }
 0x486   : > { %v3018_v23 = vadd.s32 %v1353_v62, %v1351_v56  ;;  %v1429_v13 = vsel %vm374_vm1, %v1385_v3, 0.0  ;;  %v1426_v59 = vsel %vm374_vm1, %v1384_v10, 0.0  ;;  %v991_v7 = vcvt.s32.f32 %v3345_v11 }
 0x487   : > { %1430 = vadd.xlane.f32.xlu0 %v1429_v13  ;;  %1427 = vadd.xlane.f32.xlu1 %v1426_v59  ;;  %v1452_v53 = vcvt.s32.f32 %v2936_v1  ;;  %v1460_v62 = vcvt.s32.f32 %v2951_v22  ;;  %v1453_v1 = vcvt.s32.f32 %v2955_v31  ;;  %v1458_v3 = vcvt.s32.f32 %v2966_v16 }
 0x488   : > { %vm1370_vm10 = vcmp.eq.s32.totalorder %v1996_v12, %v3018_v23  ;;  %v988_v12 = vcvt.s32.f32 %v2225_v37  ;;  %v989_v37 = vcvt.s32.f32 %v3343_v9  ;;  %v1461_v22 = vcvt.s32.f32 %v2968_v32 }
 0x489   : > { %v1386_v4 = vsel %vm1370_vm10, %v2908_v47, 0.0  ;;  %v1456_v31 = vcvt.s32.f32 %v2978_v24  ;;  %v1459_v16 = vcvt.s32.f32 %v2980_v19  ;;  %v1457_v24 = vcvt.s32.f32 %v2994_v0 }
 0x48a   : > { %v1432_v58 = vsel %vm374_vm1, %v1386_v4, 0.0  ;;  %vm1435_vm1 = vcmask 15368   ;;  %v1464_v4 = vcvt.s32.f32 %v2992_v60  ;;  %v1465_v60 = vcvt.s32.f32 %v3007_v21 }
 0x48b   : > { %1433 = vadd.xlane.f32.xlu1 %v1432_v58 }
 0x49b   : > { %v923_v43 = vpop.xlane.xlu0 %922 }
 0x49c   : > { %970 = vst.msk [vmem:[%s2840_s10] sm:$0xff] %vm969_vm11, %v923_v43 }
 0x49d   : > { %1003 = vst.msk [vmem:[%s2840_s10] sm:$0xff] %vm1002_vm12, %v986_v18  ;;  %v1466_v18 = vcvt.s32.f32 %v3005_v52  ;;  %v1467_v52 = vcvt.s32.f32 %v3018_v23 }
 0x49f   : > { %v929_v47 = vpop.xlane.xlu0 %928 }
 0x4a0   : > { %972 = vst.msk [vmem:[%s2840_s10 + $0x10] sm:$0xff] %vm969_vm11, %v929_v47  ;;  %v926_v27 = vpop.xlane.xlu1 %925 }
 0x4a1   : > { %971 = vst.msk [vmem:[%s2840_s10 + $0x8] sm:$0xff] %vm969_vm11, %v926_v27 }
 0x4a2   : > { %1005 = vst.msk [vmem:[%s2840_s10 + $0x10] sm:$0xff] %vm1002_vm12, %v988_v12  ;;  %1004 = vst.msk [vmem:[%s2840_s10 + $0x8] sm:$0xff] %vm1002_vm12, %v987_v49 }
 0x4a3   : > { %v935_v50 = vpop.xlane.xlu0 %934 }
 0x4a4   : > { %974 = vst.msk [vmem:[%s2840_s10 + $0x20] sm:$0xff] %vm969_vm11, %v935_v50  ;;  %v932_v42 = vpop.xlane.xlu1 %931 }
 0x4a5   : > { %973 = vst.msk [vmem:[%s2840_s10 + $0x18] sm:$0xff] %vm969_vm11, %v932_v42 }
 0x4a6   : > { %1007 = vst.msk [vmem:[%s2840_s10 + $0x20] sm:$0xff] %vm1002_vm12, %v990_v28  ;;  %1006 = vst.msk [vmem:[%s2840_s10 + $0x18] sm:$0xff] %vm1002_vm12, %v989_v37 }
 0x4a7   : > { %v941_v30 = vpop.xlane.xlu0 %940 }
 0x4a8   : > { %976 = vst.msk [vmem:[%s2840_s10 + $0x30] sm:$0xff] %vm969_vm11, %v941_v30  ;;  %v938_v9 = vpop.xlane.xlu1 %937 }
 0x4a9   : > { %975 = vst.msk [vmem:[%s2840_s10 + $0x28] sm:$0xff] %vm969_vm11, %v938_v9 }
 0x4aa   : > { %1009 = vst.msk [vmem:[%s2840_s10 + $0x30] sm:$0xff] %vm1002_vm12, %v992_v34  ;;  %1008 = vst.msk [vmem:[%s2840_s10 + $0x28] sm:$0xff] %vm1002_vm12, %v991_v7 }
 0x4ab   : > { %v947_v14 = vpop.xlane.xlu0 %946 }
 0x4ac   : > { %978 = vst.msk [vmem:[%s2840_s10 + $0x40] sm:$0xff] %vm969_vm11, %v947_v14  ;;  %v944_v11 = vpop.xlane.xlu1 %943 }
 0x4ad   : > { %977 = vst.msk [vmem:[%s2840_s10 + $0x38] sm:$0xff] %vm969_vm11, %v944_v11 }
 0x4ae   : > { %1011 = vst.msk [vmem:[%s2840_s10 + $0x40] sm:$0xff] %vm1002_vm12, %v994_v61  ;;  %1010 = vst.msk [vmem:[%s2840_s10 + $0x38] sm:$0xff] %vm1002_vm12, %v993_v5 }
 0x4af   : > { %v953_v33 = vpop.xlane.xlu0 %952 }
 0x4b0   : > { %980 = vst.msk [vmem:[%s2840_s10 + $0x50] sm:$0xff] %vm969_vm11, %v953_v33  ;;  %v950_v38 = vpop.xlane.xlu1 %949 }
 0x4b1   : > { %979 = vst.msk [vmem:[%s2840_s10 + $0x48] sm:$0xff] %vm969_vm11, %v950_v38 }
 0x4b2   : > { %1013 = vst.msk [vmem:[%s2840_s10 + $0x50] sm:$0xff] %vm1002_vm12, %v996_v20  ;;  %1012 = vst.msk [vmem:[%s2840_s10 + $0x48] sm:$0xff] %vm1002_vm12, %v995_v44 }
 0x4b3   : > { %v959_v39 = vpop.xlane.xlu0 %958 }
 0x4b4   : > { %982 = vst.msk [vmem:[%s2840_s10 + $0x60] sm:$0xff] %vm969_vm11, %v959_v39  ;;  %v956_v46 = vpop.xlane.xlu1 %955 }
 0x4b5   : > { %981 = vst.msk [vmem:[%s2840_s10 + $0x58] sm:$0xff] %vm969_vm11, %v956_v46 }
 0x4b6   : > { %1015 = vst.msk [vmem:[%s2840_s10 + $0x60] sm:$0xff] %vm1002_vm12, %v998_v29  ;;  %1014 = vst.msk [vmem:[%s2840_s10 + $0x58] sm:$0xff] %vm1002_vm12, %v997_v35 }
 0x4b7   : > { %v965_v36 = vpop.xlane.xlu0 %964 }
 0x4b8   : > { %984 = vst.msk [vmem:[%s2840_s10 + $0x70] sm:$0xff] %vm969_vm11, %v965_v36  ;;  %v962_v51 = vpop.xlane.xlu1 %961 }
 0x4b9   : > { %983 = vst.msk [vmem:[%s2840_s10 + $0x68] sm:$0xff] %vm969_vm11, %v962_v51 }
 0x4ba   : > { %1017 = vst.msk [vmem:[%s2840_s10 + $0x70] sm:$0xff] %vm1002_vm12, %v1000_v6  ;;  %1016 = vst.msk [vmem:[%s2840_s10 + $0x68] sm:$0xff] %vm1002_vm12, %v999_v63 }
 0x4bc   : > { %v968_v25 = vpop.xlane.xlu1 %967 }
 0x4bd   : > { %985 = vst.msk [vmem:[%s2840_s10 + $0x78] sm:$0xff] %vm969_vm11, %v968_v25 }
 0x4be   : > { %1018 = vst.msk [vmem:[%s2840_s10 + $0x78] sm:$0xff] %vm1002_vm12, %v1001_v55 }
 0x4f7   : > { %v1395_v15 = vpop.xlane.xlu0 %1394 }
 0x4f8   : > { %1438 = vst.msk [vmem:[%s2840_s10 + $0x10] sm:$0xff] %vm1435_vm1, %v1395_v15 }
 0x4f9   : > { %1471 = vst.msk [vmem:[%s2840_s10 + $0x10] sm:$0xff] %vm1468_vm13, %v1454_v17 }
 0x4fb   : > { %v1419_v48 = vpop.xlane.xlu0 %1418  ;;  %v1398_v41 = vpop.xlane.xlu1 %1397 }
 0x4fc   : > { %1446 = vst.msk [vmem:[%s2840_s10 + $0x50] sm:$0xff] %vm1435_vm1, %v1419_v48  ;;  %1439 = vst.msk [vmem:[%s2840_s10 + $0x18] sm:$0xff] %vm1435_vm1, %v1398_v41 }
 0x4fd   : > { %1479 = vst.msk [vmem:[%s2840_s10 + $0x50] sm:$0xff] %vm1468_vm13, %v1462_v54  ;;  %1472 = vst.msk [vmem:[%s2840_s10 + $0x18] sm:$0xff] %vm1468_vm13, %v1455_v2 }
 0x4ff   : > { %v1389_v40 = vpop.xlane.xlu0 %1388  ;;  %v1422_v8 = vpop.xlane.xlu1 %1421 }
 0x500   : > { %1436 = vst.msk [vmem:[%s2840_s10] sm:$0xff] %vm1435_vm1, %v1389_v40  ;;  %1447 = vst.msk [vmem:[%s2840_s10 + $0x58] sm:$0xff] %vm1435_vm1, %v1422_v8 }
 0x501   : > { %1469 = vst.msk [vmem:[%s2840_s10] sm:$0xff] %vm1468_vm13, %v1452_v53  ;;  %1480 = vst.msk [vmem:[%s2840_s10 + $0x58] sm:$0xff] %vm1468_vm13, %v1463_v26 }
 0x503   : > { %v1413_v56 = vpop.xlane.xlu0 %1412 }
 0x504   : > { %1444 = vst.msk [vmem:[%s2840_s10 + $0x40] sm:$0xff] %vm1435_vm1, %v1413_v56  ;;  %v1392_v57 = vpop.xlane.xlu1 %1391 }
 0x505   : > { %1477 = vst.msk [vmem:[%s2840_s10 + $0x40] sm:$0xff] %vm1468_vm13, %v1460_v62 }
 0x506   : > { %1437 = vst.msk [vmem:[%s2840_s10 + $0x8] sm:$0xff] %vm1435_vm1, %v1392_v57 }
 0x507   : > { %1470 = vst.msk [vmem:[%s2840_s10 + $0x8] sm:$0xff] %vm1468_vm13, %v1453_v1 }
 0x508   : > { %v1407_v13 = vpop.xlane.xlu0 %1406  ;;  %v1416_v10 = vpop.xlane.xlu1 %1415 }
 0x509   : > { %1442 = vst.msk [vmem:[%s2840_s10 + $0x30] sm:$0xff] %vm1435_vm1, %v1407_v13  ;;  %1445 = vst.msk [vmem:[%s2840_s10 + $0x48] sm:$0xff] %vm1435_vm1, %v1416_v10 }
 0x50a   : > { %1475 = vst.msk [vmem:[%s2840_s10 + $0x30] sm:$0xff] %vm1468_vm13, %v1458_v3  ;;  %1478 = vst.msk [vmem:[%s2840_s10 + $0x48] sm:$0xff] %vm1468_vm13, %v1461_v22 }
 0x50c   : > { %v1401_v59 = vpop.xlane.xlu0 %1400  ;;  %v1410_v32 = vpop.xlane.xlu1 %1409 }
 0x50d   : > { %1440 = vst.msk [vmem:[%s2840_s10 + $0x20] sm:$0xff] %vm1435_vm1, %v1401_v59  ;;  %1443 = vst.msk [vmem:[%s2840_s10 + $0x38] sm:$0xff] %vm1435_vm1, %v1410_v32 }
 0x50e   : > { %1473 = vst.msk [vmem:[%s2840_s10 + $0x20] sm:$0xff] %vm1468_vm13, %v1456_v31  ;;  %1476 = vst.msk [vmem:[%s2840_s10 + $0x38] sm:$0xff] %vm1468_vm13, %v1459_v16 }
 0x510   : > { %v1425_v19 = vpop.xlane.xlu0 %1424  ;;  %v1404_v58 = vpop.xlane.xlu1 %1403 }
 0x511   : > { %1448 = vst.msk [vmem:[%s2840_s10 + $0x60] sm:$0xff] %vm1435_vm1, %v1425_v19  ;;  %1441 = vst.msk [vmem:[%s2840_s10 + $0x28] sm:$0xff] %vm1435_vm1, %v1404_v58 }
 0x512   : > { %1481 = vst.msk [vmem:[%s2840_s10 + $0x60] sm:$0xff] %vm1468_vm13, %v1464_v4  ;;  %1474 = vst.msk [vmem:[%s2840_s10 + $0x28] sm:$0xff] %vm1468_vm13, %v1457_v24 }
 0x514   : > { %v1431_v43 = vpop.xlane.xlu0 %1430  ;;  %v1428_v0 = vpop.xlane.xlu1 %1427 }
 0x515   : > { %1450 = vst.msk [vmem:[%s2840_s10 + $0x70] sm:$0xff] %vm1435_vm1, %v1431_v43  ;;  %1449 = vst.msk [vmem:[%s2840_s10 + $0x68] sm:$0xff] %vm1435_vm1, %v1428_v0 }
 0x516   : > { %1483 = vst.msk [vmem:[%s2840_s10 + $0x70] sm:$0xff] %vm1468_vm13, %v1466_v18  ;;  %1482 = vst.msk [vmem:[%s2840_s10 + $0x68] sm:$0xff] %vm1468_vm13, %v1465_v60 }
 0x518   : > { %v1434_v21 = vpop.xlane.xlu1 %1433 }
 0x519   : > { %1451 = vst.msk [vmem:[%s2840_s10 + $0x78] sm:$0xff] %vm1435_vm1, %v1434_v21 }
 0x51a   : > { %1484 = vst.msk [vmem:[%s2840_s10 + $0x78] sm:$0xff] %vm1468_vm13, %v1467_v52 }
 0x51b   : > { %1740 = shalt.err (!%p1737_p3)
}
 0x51c   : > { %s1741_s29 = scalar_lea.hbm %s3187_s24, 2048  ;;  %s1745_s5 = scalar_lea.hbm %s3242_s3, 4096 }
 0x51d   : > { %p1742_p4 = scmp.ne.s32.totalorder %s3187_s24, %s1741_s29  ;;  %p1746_p9 = scmp.lt.u32.totalorder %s3187_s24, %s3242_s3 }
 0x51e   : > { %p1747_p10 = scmp.lt.u32.totalorder %s1745_s5, %s1741_s29  ;;  %p1749_p12 = scmp.lt.u32.totalorder %s1741_s29, %s3187_s24 }
 0x51f   : > { %p1743_p7 = pnand %p1742_p4, %p1853_p5 }
 0x520   : > { %p1748_p11 = por %p1747_p10, %p1746_p9 }
 0x521   : > { %p1744_p8 = pneg %p1743_p7 }
 0x522   : > { %p1750_p13 = por %p1749_p12, %p1748_p11 }
 0x524   : > { %p1751_p0 = pnand %p1750_p13, %p1744_p8 }
 0x526   : > { %1754 = shalt.err (!%p1751_p0)
}
 0x527   : > { %s1793_s8 = smov 128   ;;  %s1794_s9 = smov 8  }
 0x528   : > { %1619 = dma.vmem_to_hbm [thread:$0]  (%p1853_p5), %s3189_s17, 2048, %s3187_s24, %s3198_s16, %s1793_s8, %s1793_s8, %s1794_s9  }
 0x529 PF: > { %p1625_p1 = scmp.ge.s32.totalorder %s1789_s15, 2  ;;  %s1514_s10 = sand.u32 1, %s1777_s12  }
 0x52a   : > { %s1515_s11 = scalar_lea.sflag [#allocation3], %s1514_s10 }
 0x52b   : > { %p1622_p2 = pnand %p1625_p1, %p1857_p6 }
 0x52d   : > { %1772 = dma.done.wait (!%p1622_p2), %s1515_s11, 2048  }
 0x52e   : > { %1774 = vsyncadd (!%p1622_p2), %s1515_s11, 4294965248  ;;  %p13_p3 = scmp.ge.s32.totalorder %s1840_s18, 4   ;;  %s3362_s12 = smov %s1781_s13 }
 0x52f   : > { %s3363_s13 = smov %s1785_s14  ;;  %s3364_s14 = smov %s1851_s21 }
 0x530   : > { %s3365_s15 = smov %s1840_s18  ;;  %15 = sbr.rel (!%p13_p3) target bundleno = 3 (0x3), region = 67 }
 0x537   :  { %1520 = vsyncpa [#allocation3], 1 }
 0x538   :  { %1522 = vsyncpa [#allocation3 + $0x1], 1 }

</bundles_post_ra>
